<compile_context>
chip_gen: v7x
topology: tpu7x:2x2x1
jax: 0.10.0
libtpu: 0.0.40
codegen_flags: <defaults>
</compile_context>

<pallas_src>
import jax
import jax.numpy as jnp
from jax.experimental import pallas as pl
from jax.experimental.pallas import tpu as pltpu

# Hyperparameters matching the PyTorch module
HIDDEN_SIZE = 15
EMB_DIM = 5
NUM_LAYERS = 2
SEQ_LEN = 5
INPUT_DIM = 10
BATCH = 2
BATCH_BLOCK = 8          # fill the 8 f32 sublanes; one grid step per block

H = HIDDEN_SIZE
S = SEQ_LEN
E = EMB_DIM
H2, H3, H4, H6, H8 = 2 * H, 3 * H, 4 * H, 6 * H, 8 * H
SH = S * H

# Row layout of the packed LSTM-weight array (width 8H).
# Encoder gate columns are interleaved per gate: [i_f,i_b,f_f,f_b,o_f,o_b,g_f,g_b].
# Decoder blocks use (i,f,o,g) in columns 0:4H (padded to 8H).
ROWS = {}
_o = 0
for _name, _n in (("e_wihf0", E), ("e_wihb0", E), ("e_whh0", H2), ("e_b0", 1),
                  ("e_wihf1", H2), ("e_wihb1", H2), ("e_whh1", H2), ("e_b1", 1),
                  ("d_whh0", H), ("d_w1", H2), ("d_b1", 1), ("d_g0", 1)):
    ROWS[_name] = (_o, _o + _n)
    _o += _n
LSTM_PACK_ROWS = _o                    # 179
ATTN_PACK_ROWS = SH + H + 1 + SH       # 166 (width S*H)


def pointer_network_kernel(x_ref, lstm_ref, attn_ref, out_ref):
    BB = x_ref.shape[0] // S           # rows per batch block

    def rows(name, cols=H8):
        a, b = ROWS[name]
        return lstm_ref[a:b, 0:cols]

    # ---- unpack weights (static slices of VMEM-resident packs) ----
    e_wihf0 = rows("e_wihf0")          # (E, 8H)  fwd gate cols, bwd cols zero
    e_wihb0 = rows("e_wihb0")          # (E, 8H)  bwd gate cols, fwd cols zero
    e_whh0 = rows("e_whh0")            # (2H, 8H) block-diagonal [fwd ; bwd]
    e_b0 = rows("e_b0")                # (1, 8H)  b_ih + b_hh, both directions
    e_wihf1 = rows("e_wihf1")          # (2H, 8H)
    e_wihb1 = rows("e_wihb1")          # (2H, 8H)
    e_whh1 = rows("e_whh1")            # (2H, 8H)
    e_b1 = rows("e_b1")                # (1, 8H)
    d_whh0 = rows("d_whh0", H4)        # (H, 4H)
    d_w1 = rows("d_w1", H4)            # (2H, 4H) fused [W_ih ; W_hh]
    d_b1 = rows("d_b1", H4)            # (1, 4H)
    d_g0 = rows("d_g0", H4)            # (1, 4H)  precomputed token-0 input gates

    a_w1bd = attn_ref[0:SH, :]                     # (S*H, S*H) block-diag W1^T
    a_w2t = attn_ref[SH:SH + H, :]                 # (H, S*H)   W2^T tiled S times
    a_b12 = attn_ref[SH + H:SH + H + 1, :]         # (1, S*H)   b1 + b2 tiled
    a_vbd = attn_ref[SH + H + 1:SH + H + 1 + SH, 0:S]   # (S*H, S) block-diag v

    x_tm = x_ref[...]                  # (S*BB, E) time-major for this batch block

    first_h = jax.lax.broadcasted_iota(jnp.int32, (BB, H2), 1) < H

    # gate column order is (i, f, o, g): one contiguous sigmoid slab + one tanh
    def gates_fb(g, c):                # g: (BB, 8H) [i|f|o|g] x [fwd|bwd], c: (BB, 2H)
        sg = jax.nn.sigmoid(g[:, 0:H6])
        tg = jnp.tanh(g[:, H6:H8])
        i, f, o = sg[:, 0:H2], sg[:, H2:H4], sg[:, H4:H6]
        c_new = f * c + i * tg
        return o * jnp.tanh(c_new), c_new

    def gates_uni(g, c):               # g: (BB, 4H), c: (BB, H)
        sg = jax.nn.sigmoid(g[:, 0:H3])
        tg = jnp.tanh(g[:, H3:H4])
        i, f, o = sg[:, 0:H], sg[:, H:H2], sg[:, H2:H3]
        c_new = f * c + i * tg
        return o * jnp.tanh(c_new), c_new

    def bidir_layer(xg_list, w_hh_bd):
        # lane-packed fused fwd/bwd recurrence: lanes 0:H carry the forward
        # chain (time t), lanes H:2H the backward chain (time S-1-t).
        h = jnp.zeros((BB, H2), jnp.float32)
        c = jnp.zeros((BB, H2), jnp.float32)
        outs = [None] * S
        for t in range(S):                       # static unroll (S = 5)
            if t == 0:
                g = xg_list[0]                   # h == 0: skip hidden matmul
            else:
                g = jnp.dot(h, w_hh_bd,
                            preferred_element_type=jnp.float32) + xg_list[t]
            h, c = gates_fb(g, c)
            outs[t] = h
        return outs, h, c

    # ---------------- encoder layer 0 (fwd + bwd fused) ----------------
    # hoisted input-side matmuls; the fwd/bwd time reversal is folded into the
    # zero-masked dual weight packs, so combining is a plain add (no selects).
    xg0f = jnp.dot(x_tm, e_wihf0, preferred_element_type=jnp.float32) + e_b0
    xg0b = jnp.dot(x_tm, e_wihb0, preferred_element_type=jnp.float32)
    xg0_list = [xg0f[t * BB:(t + 1) * BB, :]
                + xg0b[(S - 1 - t) * BB:(S - t) * BB, :] for t in range(S)]
    outs0, hc0, cc0 = bidir_layer(xg0_list, e_whh0)

    # ---------------- encoder layer 1 (fwd + bwd fused) ----------------
    # layer-1 input at original time t = [fwd_out0(t) | bwd_out0(t)]
    x1_list = [jnp.where(first_h, outs0[t], outs0[S - 1 - t]) for t in range(S)]
    x1_tm = jnp.concatenate(x1_list, axis=0)                      # (S*BB, 2H)
    xg1f = jnp.dot(x1_tm, e_wihf1, preferred_element_type=jnp.float32) + e_b1
    xg1b = jnp.dot(x1_tm, e_wihb1, preferred_element_type=jnp.float32)
    xg1_list = [xg1f[t * BB:(t + 1) * BB, :]
                + xg1b[(S - 1 - t) * BB:(S - t) * BB, :] for t in range(S)]
    outs1, hc1, cc1 = bidir_layer(xg1_list, e_whh1)

    # encoder_outputs[:, :, :H] + encoder_outputs[:, :, H:], laid out lane-dense
    enc_cat = jnp.concatenate(
        [outs1[t][:, 0:H] + outs1[S - 1 - t][:, H:H2] for t in range(S)],
        axis=-1)                                                  # (BB, S*H)
    # decoder initial states = fwd + bwd final states per layer
    h0 = hc0[:, 0:H] + hc0[:, H:H2]
    c0 = cc0[:, 0:H] + cc0[:, H:H2]
    h1 = hc1[:, 0:H] + hc1[:, H:H2]
    c1 = cc1[:, 0:H] + cc1[:, H:H2]

    # hoisted encoder-side attention energy, lane-dense (w2 bias folded in)
    enc_e = jnp.dot(enc_cat, a_w1bd, preferred_element_type=jnp.float32) + a_b12

    # ---------------- decoder + pointer attention ----------------
    cols = []
    for _ in range(S):                           # static unroll decode steps
        # layer 0: only the hidden-side matmul sits on the recurrence
        g0 = jnp.dot(h0, d_whh0, preferred_element_type=jnp.float32) + d_g0
        h0, c0 = gates_uni(g0, c0)
        # layer 1: fuse input- and hidden-side matmuls into one [h0|h1] matmul
        xh = jnp.concatenate([h0, h1], axis=-1)                  # (BB, 2H)
        g1 = jnp.dot(xh, d_w1, preferred_element_type=jnp.float32) + d_b1
        h1, c1 = gates_uni(g1, c1)
        # lane-dense attention: everything stays inside one (BB, S*H) vreg
        dec_e = jnp.dot(h1, a_w2t, preferred_element_type=jnp.float32)
        combined = jnp.tanh(enc_e + dec_e)                       # (BB, S*H)
        energy = jnp.dot(combined, a_vbd,
                         preferred_element_type=jnp.float32)     # (BB, S)
        energy = energy - jnp.max(energy, axis=-1, keepdims=True)
        p = jnp.exp(energy)
        cols.append(p / jnp.sum(p, axis=-1, keepdims=True))      # exact softmax
    out_ref[...] = jnp.concatenate(cols, axis=-1)                # (BB, S*S)


def pointer_network_forward(x_emb, lstm_pack, attn_pack):
    B, s_, e_ = x_emb.shape
    assert (s_, e_) == (S, E)
    if B <= BATCH_BLOCK:
        bb = BATCH_BLOCK
    else:
        # v7x megacore: aim for >= 2 grid blocks so both TensorCores get work,
        # while keeping blocks fat to amortize the fixed serial-chain latency.
        half = (B + 1) // 2
        bb = ((half + BATCH_BLOCK - 1) // BATCH_BLOCK) * BATCH_BLOCK
    nblk = (B + bb - 1) // bb
    b_pad = nblk * bb
    if b_pad != B:
        x_emb = jnp.pad(x_emb, ((0, b_pad - B), (0, 0), (0, 0)))
    # Pre-arrange per batch block as time-major rows (blk, t, b) -> one dense
    # 2D slab per grid step; no layout shuffles inside the kernel.
    x_arr = x_emb.reshape(nblk, bb, S, E).transpose(0, 2, 1, 3) \
                 .reshape(nblk * S * bb, E)
    out = pl.pallas_call(
        pointer_network_kernel,
        out_shape=jax.ShapeDtypeStruct((b_pad, S * S), jnp.float32),
        grid=(nblk,),
        in_specs=[
            pl.BlockSpec((S * bb, E), lambda i: (i, 0)),
            pl.BlockSpec(lstm_pack.shape, lambda i: (0, 0)),
            pl.BlockSpec(attn_pack.shape, lambda i: (0, 0)),
        ],
        out_specs=pl.BlockSpec((bb, S * S), lambda i: (i, 0)),
        compiler_params=pltpu.CompilerParams(
            dimension_semantics=("parallel",)),
    )(x_arr, lstm_pack, attn_pack)
    # out[b, i*S + j] = attention over position j at decode step i
    return out.reshape(b_pad, S, S).transpose(0, 2, 1)[:B]


def init_params(key):
    """Deterministic synthetic parameters in the PyTorch layout."""
    scale = 1.0 / (H ** 0.5)
    keys = iter(jax.random.split(key, 64))

    def u(shape, s=scale):
        return jax.random.uniform(next(keys), shape, jnp.float32, -s, s)

    emb_table = u((INPUT_DIM, EMB_DIM), 1.0)

    def lstm_layer(in_dim):
        w_ih = u((4 * H, in_dim))
        w_hh = u((4 * H, H))
        b = u((1, 4 * H)) + u((1, 4 * H))     # b_ih + b_hh folded (exact)
        return (w_ih, w_hh, b)

    enc_l0f = lstm_layer(EMB_DIM)
    enc_l0b = lstm_layer(EMB_DIM)
    enc_l1f = lstm_layer(2 * H)
    enc_l1b = lstm_layer(2 * H)
    dec_l0 = lstm_layer(EMB_DIM)
    dec_l1 = lstm_layer(H)

    a_w1, a_b1 = u((H, H)), u((1, H))
    a_w2, a_b2 = u((H, H)), u((1, H))
    a_v = u((1, H))                           # nn.Linear(H, 1, bias=False).weight

    raw = (enc_l0f, enc_l0b, enc_l1f, enc_l1b, dec_l0, dec_l1,
           a_w1, a_b1, a_w2, a_b2, a_v)
    return emb_table, raw


def pack_params(raw, emb_table):
    """Pre-transpose / reorder / pack all weights into 2 arrays (host/XLA, once)."""
    (enc_l0f, enc_l0b, enc_l1f, enc_l1b, dec_l0, dec_l1,
     a_w1, a_b1, a_w2, a_b2, a_v) = raw

    def reorder_w(w):     # (4H, in) PyTorch (i,f,g,o) rows -> (in, 4H) (i,f,o,g) cols
        return jnp.concatenate([w[0:H], w[H:H2], w[H3:H4], w[H2:H3]], axis=0).T

    def reorder_b(b):     # (1, 4H) (i,f,g,o) -> (i,f,o,g)
        return jnp.concatenate(
            [b[:, 0:H], b[:, H:H2], b[:, H3:H4], b[:, H2:H3]], axis=1)

    def interleave(wf, wb):   # (r,4H),(r,4H) -> (r,8H) per-gate [fwd | bwd]
        return jnp.concatenate(
            [jnp.concatenate([wf[:, k * H:(k + 1) * H],
                              wb[:, k * H:(k + 1) * H]], axis=1)
             for k in range(4)], axis=1)

    def enc_layer(lf, lb):
        wihf, wihb = reorder_w(lf[0]), reorder_w(lb[0])        # (in, 4H)
        whhf, whhb = reorder_w(lf[1]), reorder_w(lb[1])        # (H, 4H)
        bf, bb_ = reorder_b(lf[2]), reorder_b(lb[2])           # (1, 4H)
        wih_f_pack = interleave(wihf, jnp.zeros_like(wihb))    # bwd cols zeroed
        wih_b_pack = interleave(jnp.zeros_like(wihf), wihb)    # fwd cols zeroed
        whh_pack = jnp.concatenate(
            [interleave(whhf, jnp.zeros_like(whhf)),
             interleave(jnp.zeros_like(whhb), whhb)], axis=0)  # (2H, 8H) block-diag
        b_pack = interleave(bf, bb_)                           # (1, 8H)
        return [wih_f_pack, wih_b_pack, whh_pack, b_pack]

    def pad8h(a):
        return jnp.pad(a, ((0, 0), (0, H8 - a.shape[1])))

    dec0_wih = reorder_w(dec_l0[0])            # (E, 4H)
    dec0_whh = reorder_w(dec_l0[1])            # (H, 4H)
    dec0_b = reorder_b(dec_l0[2])              # (1, 4H)
    # decoder input is always the embedding of token 0 -> precompute its gates
    dg0 = emb_table[0:1, :] @ dec0_wih + dec0_b                # (1, 4H)

    dec1_w = jnp.concatenate(
        [reorder_w(dec_l1[0]), reorder_w(dec_l1[1])], axis=0)  # (2H, 4H)
    dec1_b = reorder_b(dec_l1[2])

    lstm_pack = jnp.concatenate(
        enc_layer(enc_l0f, enc_l0b) + enc_layer(enc_l1f, enc_l1b)
        + [pad8h(dec0_whh), pad8h(dec1_w), pad8h(dec1_b), pad8h(dg0)], axis=0)
    assert lstm_pack.shape == (LSTM_PACK_ROWS, H8), lstm_pack.shape

    # lane-dense attention pack (width S*H = 75)
    eye_s = jnp.eye(S, dtype=jnp.float32)
    w1_bd = jnp.kron(eye_s, a_w1.T)                   # (S*H, S*H) block-diag
    w2_tiled = jnp.tile(a_w2.T, (1, S))               # (H, S*H)
    b12_tiled = jnp.tile(a_b1 + a_b2, (1, S))         # (1, S*H) (w2 bias folded)
    v_bd = jnp.kron(eye_s, a_v.T)                     # (S*H, S)
    v_bd = jnp.pad(v_bd, ((0, 0), (0, SH - S)))       # pad to pack width
    attn_pack = jnp.concatenate([w1_bd, w2_tiled, b12_tiled, v_bd], axis=0)
    assert attn_pack.shape == (ATTN_PACK_ROWS, SH), attn_pack.shape
    return lstm_pack, attn_pack


def reference_forward(x_emb, dec_emb, raw):
    """Straightforward (unfused) pure-JAX reference of the PyTorch forward."""
    (enc_l0f, enc_l0b, enc_l1f, enc_l1b, dec_l0, dec_l1,
     a_w1, a_b1, a_w2, a_b2, a_v) = raw
    B, S_, _ = x_emb.shape

    def cell(x, h, c, p):
        w_ih, w_hh, b = p
        g = x @ w_ih.T + h @ w_hh.T + b
        i = jax.nn.sigmoid(g[:, 0:H])
        f = jax.nn.sigmoid(g[:, H:2 * H])
        gg = jnp.tanh(g[:, 2 * H:3 * H])
        o = jax.nn.sigmoid(g[:, 3 * H:4 * H])
        c = f * c + i * gg
        return o * jnp.tanh(c), c

    def run_dir(xs, p, reverse):
        h = jnp.zeros((B, H), jnp.float32)
        c = jnp.zeros((B, H), jnp.float32)
        outs = [None] * S_
        order = range(S_ - 1, -1, -1) if reverse else range(S_)
        for t in order:
            h, c = cell(xs[:, t, :], h, c, p)
            outs[t] = h
        return jnp.stack(outs, axis=1), h, c

    of0, hf0, cf0 = run_dir(x_emb, enc_l0f, False)
    ob0, hb0, cb0 = run_dir(x_emb, enc_l0b, True)
    l1_in = jnp.concatenate([of0, ob0], axis=-1)
    of1, hf1, cf1 = run_dir(l1_in, enc_l1f, False)
    ob1, hb1, cb1 = run_dir(l1_in, enc_l1b, True)

    enc = of1 + ob1
    h0, c0 = hf0 + hb0, cf0 + cb0
    h1, c1 = hf1 + hb1, cf1 + cb1
    dec_x = jnp.broadcast_to(dec_emb, (B, EMB_DIM))
    enc_e = enc @ a_w1.T + a_b1

    cols = []
    for _ in range(S_):
        h0, c0 = cell(dec_x, h0, c0, dec_l0)
        h1, c1 = cell(h0, h1, c1, dec_l1)
        dec_e = h1 @ a_w2.T + a_b2
        comb = jnp.tanh(enc_e + dec_e[:, None, :])
        energy = jnp.sum(comb * a_v.reshape(1, 1, H), axis=-1)
        cols.append(jax.nn.softmax(energy, axis=-1))
    return jnp.stack(cols, axis=-1)


if __name__ == "__main__":
    key = jax.random.PRNGKey(0)
    k_inp, k_par = jax.random.split(key)

    tokens = jax.random.randint(k_inp, (BATCH, SEQ_LEN), 0, INPUT_DIM)
    emb_table, raw_params = init_params(k_par)
    lstm_pack, attn_pack = pack_params(raw_params, emb_table)

    # Embedding gather is plain-JAX glue (no clean Pallas equivalent needed).
    x_emb = emb_table[tokens]          # (B, S, E)

    logits = pointer_network_forward(x_emb, lstm_pack, attn_pack)
    logits = jax.block_until_ready(logits)

    assert logits.shape == (BATCH, SEQ_LEN, SEQ_LEN), logits.shape
    assert bool(jnp.all(jnp.isfinite(logits)))
    # each logits[:, :, i] is a softmax over sequence positions -> sums to 1
    col_sums = jnp.sum(logits, axis=1)
    assert bool(jnp.all(jnp.abs(col_sums - 1.0) < 1e-3)), col_sums
    # compare against a straightforward pure-JAX reference of the same math
    dec_emb = emb_table[0:1, :]        # decoder always feeds token 0
    ref = reference_forward(x_emb, dec_emb, raw_params)
    max_err = float(jnp.max(jnp.abs(logits - ref)))
    assert max_err < 1e-3, f"max abs err vs reference: {max_err}"

    print("KERNEL_OK")
</pallas_src>

<mosaic_0001>
module attributes {stable_mosaic.version = 11 : i64} {
  func.func @pointer_network_kernel(%arg0: i32, %arg1: memref<40x5xf32, #tpu.memory_space<vmem>>, %arg2: memref<179x120xf32, #tpu.memory_space<vmem>>, %arg3: memref<166x75xf32, #tpu.memory_space<vmem>>, %arg4: memref<8x25xf32, #tpu.memory_space<vmem>>) attributes {dimension_semantics = [#tpu.dimension_semantics<parallel>], iteration_bounds = array<i64: 1>, scalar_prefetch = 0 : i64, scratch_operands = 0 : i64, tpu.core_type = #tpu.core_type<tc>, window_params = [{transform_indices = @transform_0, window_bounds = array<i64: 40, 5>}, {pipeline_mode = #tpu.pipeline_mode<synchronous>, transform_indices = @transform_1, window_bounds = array<i64: 179, 120>}, {pipeline_mode = #tpu.pipeline_mode<synchronous>, transform_indices = @transform_2, window_bounds = array<i64: 166, 75>}, {transform_indices = @transform_3, window_bounds = array<i64: 8, 25>}]} {
    %c0 = arith.constant 0 : index
    %c0_0 = arith.constant 0 : index
    %0 = vector.load %arg2[%c0, %c0_0] : memref<179x120xf32, #tpu.memory_space<vmem>>, vector<5x120xf32>
    %c5 = arith.constant 5 : index
    %c0_1 = arith.constant 0 : index
    %1 = vector.load %arg2[%c5, %c0_1] : memref<179x120xf32, #tpu.memory_space<vmem>>, vector<5x120xf32>
    %c10 = arith.constant 10 : index
    %c0_2 = arith.constant 0 : index
    %2 = vector.load %arg2[%c10, %c0_2] : memref<179x120xf32, #tpu.memory_space<vmem>>, vector<30x120xf32>
    %c40 = arith.constant 40 : index
    %c0_3 = arith.constant 0 : index
    %3 = vector.load %arg2[%c40, %c0_3] : memref<179x120xf32, #tpu.memory_space<vmem>>, vector<1x120xf32>
    %c41 = arith.constant 41 : index
    %c0_4 = arith.constant 0 : index
    %4 = vector.load %arg2[%c41, %c0_4] : memref<179x120xf32, #tpu.memory_space<vmem>>, vector<30x120xf32>
    %c71 = arith.constant 71 : index
    %c0_5 = arith.constant 0 : index
    %5 = vector.load %arg2[%c71, %c0_5] : memref<179x120xf32, #tpu.memory_space<vmem>>, vector<30x120xf32>
    %c101 = arith.constant 101 : index
    %c0_6 = arith.constant 0 : index
    %6 = vector.load %arg2[%c101, %c0_6] : memref<179x120xf32, #tpu.memory_space<vmem>>, vector<30x120xf32>
    %c131 = arith.constant 131 : index
    %c0_7 = arith.constant 0 : index
    %7 = vector.load %arg2[%c131, %c0_7] : memref<179x120xf32, #tpu.memory_space<vmem>>, vector<1x120xf32>
    %c132 = arith.constant 132 : index
    %c0_8 = arith.constant 0 : index
    %8 = vector.load %arg2[%c132, %c0_8] : memref<179x120xf32, #tpu.memory_space<vmem>>, vector<15x60xf32>
    %c147 = arith.constant 147 : index
    %c0_9 = arith.constant 0 : index
    %9 = vector.load %arg2[%c147, %c0_9] : memref<179x120xf32, #tpu.memory_space<vmem>>, vector<30x60xf32>
    %c177 = arith.constant 177 : index
    %c0_10 = arith.constant 0 : index
    %10 = vector.load %arg2[%c177, %c0_10] : memref<179x120xf32, #tpu.memory_space<vmem>>, vector<1x60xf32>
    %c178 = arith.constant 178 : index
    %c0_11 = arith.constant 0 : index
    %11 = vector.load %arg2[%c178, %c0_11] : memref<179x120xf32, #tpu.memory_space<vmem>>, vector<1x60xf32>
    %c0_12 = arith.constant 0 : index
    %c0_13 = arith.constant 0 : index
    %12 = vector.load %arg3[%c0_12, %c0_13] : memref<166x75xf32, #tpu.memory_space<vmem>>, vector<75x75xf32>
    %c75 = arith.constant 75 : index
    %c0_14 = arith.constant 0 : index
    %13 = vector.load %arg3[%c75, %c0_14] : memref<166x75xf32, #tpu.memory_space<vmem>>, vector<15x75xf32>
    %c90 = arith.constant 90 : index
    %c0_15 = arith.constant 0 : index
    %14 = vector.load %arg3[%c90, %c0_15] : memref<166x75xf32, #tpu.memory_space<vmem>>, vector<1x75xf32>
    %c91 = arith.constant 91 : index
    %c0_16 = arith.constant 0 : index
    %15 = vector.load %arg3[%c91, %c0_16] : memref<166x75xf32, #tpu.memory_space<vmem>>, vector<75x5xf32>
    %c0_17 = arith.constant 0 : index
    %c0_18 = arith.constant 0 : index
    %16 = vector.load %arg1[%c0_17, %c0_18] : memref<40x5xf32, #tpu.memory_space<vmem>>, vector<40x5xf32>
    %17 = tpu.iota {dimensions = array<i32: 1>} : vector<8x30xi32>
    %c15_i32 = arith.constant 15 : i32
    %18 = vector.broadcast %c15_i32 : i32 to vector<8x30xi32>
    %19 = arith.cmpi slt, %17, %18 : vector<8x30xi32>
    %cst = arith.constant dense<0.000000e+00> : vector<40x120xf32>
    %20 = tpu.matmul %16, %0, %cst {dimension_numbers = #tpu.dot_dimension_numbers<[1], [0], [0], [1], [0, 0, 1, 1], [], []>} : vector<40x5xf32>, vector<5x120xf32>, vector<40x120xf32> -> vector<40x120xf32>
    %21 = vector.broadcast %3 : vector<1x120xf32> to vector<40x120xf32>
    %22 = arith.addf %20, %21 : vector<40x120xf32>
    %cst_19 = arith.constant dense<0.000000e+00> : vector<40x120xf32>
    %23 = tpu.matmul %16, %1, %cst_19 {dimension_numbers = #tpu.dot_dimension_numbers<[1], [0], [0], [1], [0, 0, 1, 1], [], []>} : vector<40x5xf32>, vector<5x120xf32>, vector<40x120xf32> -> vector<40x120xf32>
    %24 = vector.extract_strided_slice %22 {offsets = [0, 0], sizes = [8, 120], strides = [1, 1]} : vector<40x120xf32> to vector<8x120xf32>
    %25 = vector.extract_strided_slice %23 {offsets = [32, 0], sizes = [8, 120], strides = [1, 1]} : vector<40x120xf32> to vector<8x120xf32>
    %26 = arith.addf %24, %25 : vector<8x120xf32>
    %27 = vector.extract_strided_slice %22 {offsets = [8, 0], sizes = [8, 120], strides = [1, 1]} : vector<40x120xf32> to vector<8x120xf32>
    %28 = vector.extract_strided_slice %23 {offsets = [24, 0], sizes = [8, 120], strides = [1, 1]} : vector<40x120xf32> to vector<8x120xf32>
    %29 = arith.addf %27, %28 : vector<8x120xf32>
    %30 = vector.extract_strided_slice %22 {offsets = [16, 0], sizes = [8, 120], strides = [1, 1]} : vector<40x120xf32> to vector<8x120xf32>
    %31 = vector.extract_strided_slice %23 {offsets = [16, 0], sizes = [8, 120], strides = [1, 1]} : vector<40x120xf32> to vector<8x120xf32>
    %32 = arith.addf %30, %31 : vector<8x120xf32>
    %33 = vector.extract_strided_slice %22 {offsets = [24, 0], sizes = [8, 120], strides = [1, 1]} : vector<40x120xf32> to vector<8x120xf32>
    %34 = vector.extract_strided_slice %23 {offsets = [8, 0], sizes = [8, 120], strides = [1, 1]} : vector<40x120xf32> to vector<8x120xf32>
    %35 = arith.addf %33, %34 : vector<8x120xf32>
    %36 = vector.extract_strided_slice %22 {offsets = [32, 0], sizes = [8, 120], strides = [1, 1]} : vector<40x120xf32> to vector<8x120xf32>
    %37 = vector.extract_strided_slice %23 {offsets = [0, 0], sizes = [8, 120], strides = [1, 1]} : vector<40x120xf32> to vector<8x120xf32>
    %38 = arith.addf %36, %37 : vector<8x120xf32>
    %cst_20 = arith.constant 0.000000e+00 : f32
    %39 = vector.broadcast %cst_20 : f32 to vector<8x30xf32>
    %40 = vector.extract_strided_slice %26 {offsets = [0, 0], sizes = [8, 90], strides = [1, 1]} : vector<8x120xf32> to vector<8x90xf32>
    %41 = arith.negf %40 : vector<8x90xf32>
    %42 = math.exp %41 : vector<8x90xf32>
    %cst_21 = arith.constant 1.000000e+00 : f32
    %43 = vector.broadcast %cst_21 : f32 to vector<8x90xf32>
    %44 = arith.addf %43, %42 : vector<8x90xf32>
    %45 = arith.divf %43, %44 : vector<8x90xf32>
    %46 = vector.extract_strided_slice %26 {offsets = [0, 90], sizes = [8, 30], strides = [1, 1]} : vector<8x120xf32> to vector<8x30xf32>
    %47 = math.tanh %46 : vector<8x30xf32>
    %48 = vector.extract_strided_slice %45 {offsets = [0, 0], sizes = [8, 30], strides = [1, 1]} : vector<8x90xf32> to vector<8x30xf32>
    %49 = vector.extract_strided_slice %45 {offsets = [0, 30], sizes = [8, 30], strides = [1, 1]} : vector<8x90xf32> to vector<8x30xf32>
    %50 = vector.extract_strided_slice %45 {offsets = [0, 60], sizes = [8, 30], strides = [1, 1]} : vector<8x90xf32> to vector<8x30xf32>
    %51 = arith.mulf %49, %39 : vector<8x30xf32>
    %52 = arith.mulf %48, %47 : vector<8x30xf32>
    %53 = arith.addf %51, %52 : vector<8x30xf32>
    %54 = math.tanh %53 : vector<8x30xf32>
    %55 = arith.mulf %50, %54 : vector<8x30xf32>
    %cst_22 = arith.constant dense<0.000000e+00> : vector<8x120xf32>
    %56 = tpu.matmul %55, %2, %cst_22 {dimension_numbers = #tpu.dot_dimension_numbers<[1], [0], [0], [1], [0, 0, 1, 1], [], []>} : vector<8x30xf32>, vector<30x120xf32>, vector<8x120xf32> -> vector<8x120xf32>
    %57 = arith.addf %56, %29 : vector<8x120xf32>
    %58 = vector.extract_strided_slice %57 {offsets = [0, 0], sizes = [8, 90], strides = [1, 1]} : vector<8x120xf32> to vector<8x90xf32>
    %59 = arith.negf %58 : vector<8x90xf32>
    %60 = math.exp %59 : vector<8x90xf32>
    %cst_23 = arith.constant 1.000000e+00 : f32
    %61 = vector.broadcast %cst_23 : f32 to vector<8x90xf32>
    %62 = arith.addf %61, %60 : vector<8x90xf32>
    %63 = arith.divf %61, %62 : vector<8x90xf32>
    %64 = vector.extract_strided_slice %57 {offsets = [0, 90], sizes = [8, 30], strides = [1, 1]} : vector<8x120xf32> to vector<8x30xf32>
    %65 = math.tanh %64 : vector<8x30xf32>
    %66 = vector.extract_strided_slice %63 {offsets = [0, 0], sizes = [8, 30], strides = [1, 1]} : vector<8x90xf32> to vector<8x30xf32>
    %67 = vector.extract_strided_slice %63 {offsets = [0, 30], sizes = [8, 30], strides = [1, 1]} : vector<8x90xf32> to vector<8x30xf32>
    %68 = vector.extract_strided_slice %63 {offsets = [0, 60], sizes = [8, 30], strides = [1, 1]} : vector<8x90xf32> to vector<8x30xf32>
    %69 = arith.mulf %67, %53 : vector<8x30xf32>
    %70 = arith.mulf %66, %65 : vector<8x30xf32>
    %71 = arith.addf %69, %70 : vector<8x30xf32>
    %72 = math.tanh %71 : vector<8x30xf32>
    %73 = arith.mulf %68, %72 : vector<8x30xf32>
    %cst_24 = arith.constant dense<0.000000e+00> : vector<8x120xf32>
    %74 = tpu.matmul %73, %2, %cst_24 {dimension_numbers = #tpu.dot_dimension_numbers<[1], [0], [0], [1], [0, 0, 1, 1], [], []>} : vector<8x30xf32>, vector<30x120xf32>, vector<8x120xf32> -> vector<8x120xf32>
    %75 = arith.addf %74, %32 : vector<8x120xf32>
    %76 = vector.extract_strided_slice %75 {offsets = [0, 0], sizes = [8, 90], strides = [1, 1]} : vector<8x120xf32> to vector<8x90xf32>
    %77 = arith.negf %76 : vector<8x90xf32>
    %78 = math.exp %77 : vector<8x90xf32>
    %cst_25 = arith.constant 1.000000e+00 : f32
    %79 = vector.broadcast %cst_25 : f32 to vector<8x90xf32>
    %80 = arith.addf %79, %78 : vector<8x90xf32>
    %81 = arith.divf %79, %80 : vector<8x90xf32>
    %82 = vector.extract_strided_slice %75 {offsets = [0, 90], sizes = [8, 30], strides = [1, 1]} : vector<8x120xf32> to vector<8x30xf32>
    %83 = math.tanh %82 : vector<8x30xf32>
    %84 = vector.extract_strided_slice %81 {offsets = [0, 0], sizes = [8, 30], strides = [1, 1]} : vector<8x90xf32> to vector<8x30xf32>
    %85 = vector.extract_strided_slice %81 {offsets = [0, 30], sizes = [8, 30], strides = [1, 1]} : vector<8x90xf32> to vector<8x30xf32>
    %86 = vector.extract_strided_slice %81 {offsets = [0, 60], sizes = [8, 30], strides = [1, 1]} : vector<8x90xf32> to vector<8x30xf32>
    %87 = arith.mulf %85, %71 : vector<8x30xf32>
    %88 = arith.mulf %84, %83 : vector<8x30xf32>
    %89 = arith.addf %87, %88 : vector<8x30xf32>
    %90 = math.tanh %89 : vector<8x30xf32>
    %91 = arith.mulf %86, %90 : vector<8x30xf32>
    %cst_26 = arith.constant dense<0.000000e+00> : vector<8x120xf32>
    %92 = tpu.matmul %91, %2, %cst_26 {dimension_numbers = #tpu.dot_dimension_numbers<[1], [0], [0], [1], [0, 0, 1, 1], [], []>} : vector<8x30xf32>, vector<30x120xf32>, vector<8x120xf32> -> vector<8x120xf32>
    %93 = arith.addf %92, %35 : vector<8x120xf32>
    %94 = vector.extract_strided_slice %93 {offsets = [0, 0], sizes = [8, 90], strides = [1, 1]} : vector<8x120xf32> to vector<8x90xf32>
    %95 = arith.negf %94 : vector<8x90xf32>
    %96 = math.exp %95 : vector<8x90xf32>
    %cst_27 = arith.constant 1.000000e+00 : f32
    %97 = vector.broadcast %cst_27 : f32 to vector<8x90xf32>
    %98 = arith.addf %97, %96 : vector<8x90xf32>
    %99 = arith.divf %97, %98 : vector<8x90xf32>
    %100 = vector.extract_strided_slice %93 {offsets = [0, 90], sizes = [8, 30], strides = [1, 1]} : vector<8x120xf32> to vector<8x30xf32>
    %101 = math.tanh %100 : vector<8x30xf32>
    %102 = vector.extract_strided_slice %99 {offsets = [0, 0], sizes = [8, 30], strides = [1, 1]} : vector<8x90xf32> to vector<8x30xf32>
    %103 = vector.extract_strided_slice %99 {offsets = [0, 30], sizes = [8, 30], strides = [1, 1]} : vector<8x90xf32> to vector<8x30xf32>
    %104 = vector.extract_strided_slice %99 {offsets = [0, 60], sizes = [8, 30], strides = [1, 1]} : vector<8x90xf32> to vector<8x30xf32>
    %105 = arith.mulf %103, %89 : vector<8x30xf32>
    %106 = arith.mulf %102, %101 : vector<8x30xf32>
    %107 = arith.addf %105, %106 : vector<8x30xf32>
    %108 = math.tanh %107 : vector<8x30xf32>
    %109 = arith.mulf %104, %108 : vector<8x30xf32>
    %cst_28 = arith.constant dense<0.000000e+00> : vector<8x120xf32>
    %110 = tpu.matmul %109, %2, %cst_28 {dimension_numbers = #tpu.dot_dimension_numbers<[1], [0], [0], [1], [0, 0, 1, 1], [], []>} : vector<8x30xf32>, vector<30x120xf32>, vector<8x120xf32> -> vector<8x120xf32>
    %111 = arith.addf %110, %38 : vector<8x120xf32>
    %112 = vector.extract_strided_slice %111 {offsets = [0, 0], sizes = [8, 90], strides = [1, 1]} : vector<8x120xf32> to vector<8x90xf32>
    %113 = arith.negf %112 : vector<8x90xf32>
    %114 = math.exp %113 : vector<8x90xf32>
    %cst_29 = arith.constant 1.000000e+00 : f32
    %115 = vector.broadcast %cst_29 : f32 to vector<8x90xf32>
    %116 = arith.addf %115, %114 : vector<8x90xf32>
    %117 = arith.divf %115, %116 : vector<8x90xf32>
    %118 = vector.extract_strided_slice %111 {offsets = [0, 90], sizes = [8, 30], strides = [1, 1]} : vector<8x120xf32> to vector<8x30xf32>
    %119 = math.tanh %118 : vector<8x30xf32>
    %120 = vector.extract_strided_slice %117 {offsets = [0, 0], sizes = [8, 30], strides = [1, 1]} : vector<8x90xf32> to vector<8x30xf32>
    %121 = vector.extract_strided_slice %117 {offsets = [0, 30], sizes = [8, 30], strides = [1, 1]} : vector<8x90xf32> to vector<8x30xf32>
    %122 = vector.extract_strided_slice %117 {offsets = [0, 60], sizes = [8, 30], strides = [1, 1]} : vector<8x90xf32> to vector<8x30xf32>
    %123 = arith.mulf %121, %107 : vector<8x30xf32>
    %124 = arith.mulf %120, %119 : vector<8x30xf32>
    %125 = arith.addf %123, %124 : vector<8x30xf32>
    %126 = math.tanh %125 : vector<8x30xf32>
    %127 = arith.mulf %122, %126 : vector<8x30xf32>
    %128 = arith.select %19, %55, %127 : vector<8x30xi1>, vector<8x30xf32>
    %129 = arith.select %19, %73, %109 : vector<8x30xi1>, vector<8x30xf32>
    %130 = arith.select %19, %91, %91 : vector<8x30xi1>, vector<8x30xf32>
    %131 = arith.select %19, %109, %73 : vector<8x30xi1>, vector<8x30xf32>
    %132 = arith.select %19, %127, %55 : vector<8x30xi1>, vector<8x30xf32>
    %133 = tpu.concatenate %128, %129, %130, %131, %132 in 0 : vector<8x30xf32>, vector<8x30xf32>, vector<8x30xf32>, vector<8x30xf32>, vector<8x30xf32> -> vector<40x30xf32>
    %cst_30 = arith.constant dense<0.000000e+00> : vector<40x120xf32>
    %134 = tpu.matmul %133, %4, %cst_30 {dimension_numbers = #tpu.dot_dimension_numbers<[1], [0], [0], [1], [0, 0, 1, 1], [], []>} : vector<40x30xf32>, vector<30x120xf32>, vector<40x120xf32> -> vector<40x120xf32>
    %135 = vector.broadcast %7 : vector<1x120xf32> to vector<40x120xf32>
    %136 = arith.addf %134, %135 : vector<40x120xf32>
    %cst_31 = arith.constant dense<0.000000e+00> : vector<40x120xf32>
    %137 = tpu.matmul %133, %5, %cst_31 {dimension_numbers = #tpu.dot_dimension_numbers<[1], [0], [0], [1], [0, 0, 1, 1], [], []>} : vector<40x30xf32>, vector<30x120xf32>, vector<40x120xf32> -> vector<40x120xf32>
    %138 = vector.extract_strided_slice %136 {offsets = [0, 0], sizes = [8, 120], strides = [1, 1]} : vector<40x120xf32> to vector<8x120xf32>
    %139 = vector.extract_strided_slice %137 {offsets = [32, 0], sizes = [8, 120], strides = [1, 1]} : vector<40x120xf32> to vector<8x120xf32>
    %140 = arith.addf %138, %139 : vector<8x120xf32>
    %141 = vector.extract_strided_slice %136 {offsets = [8, 0], sizes = [8, 120], strides = [1, 1]} : vector<40x120xf32> to vector<8x120xf32>
    %142 = vector.extract_strided_slice %137 {offsets = [24, 0], sizes = [8, 120], strides = [1, 1]} : vector<40x120xf32> to vector<8x120xf32>
    %143 = arith.addf %141, %142 : vector<8x120xf32>
    %144 = vector.extract_strided_slice %136 {offsets = [16, 0], sizes = [8, 120], strides = [1, 1]} : vector<40x120xf32> to vector<8x120xf32>
    %145 = vector.extract_strided_slice %137 {offsets = [16, 0], sizes = [8, 120], strides = [1, 1]} : vector<40x120xf32> to vector<8x120xf32>
    %146 = arith.addf %144, %145 : vector<8x120xf32>
    %147 = vector.extract_strided_slice %136 {offsets = [24, 0], sizes = [8, 120], strides = [1, 1]} : vector<40x120xf32> to vector<8x120xf32>
    %148 = vector.extract_strided_slice %137 {offsets = [8, 0], sizes = [8, 120], strides = [1, 1]} : vector<40x120xf32> to vector<8x120xf32>
    %149 = arith.addf %147, %148 : vector<8x120xf32>
    %150 = vector.extract_strided_slice %136 {offsets = [32, 0], sizes = [8, 120], strides = [1, 1]} : vector<40x120xf32> to vector<8x120xf32>
    %151 = vector.extract_strided_slice %137 {offsets = [0, 0], sizes = [8, 120], strides = [1, 1]} : vector<40x120xf32> to vector<8x120xf32>
    %152 = arith.addf %150, %151 : vector<8x120xf32>
    %cst_32 = arith.constant 0.000000e+00 : f32
    %153 = vector.broadcast %cst_32 : f32 to vector<8x30xf32>
    %154 = vector.extract_strided_slice %140 {offsets = [0, 0], sizes = [8, 90], strides = [1, 1]} : vector<8x120xf32> to vector<8x90xf32>
    %155 = arith.negf %154 : vector<8x90xf32>
    %156 = math.exp %155 : vector<8x90xf32>
    %cst_33 = arith.constant 1.000000e+00 : f32
    %157 = vector.broadcast %cst_33 : f32 to vector<8x90xf32>
    %158 = arith.addf %157, %156 : vector<8x90xf32>
    %159 = arith.divf %157, %158 : vector<8x90xf32>
    %160 = vector.extract_strided_slice %140 {offsets = [0, 90], sizes = [8, 30], strides = [1, 1]} : vector<8x120xf32> to vector<8x30xf32>
    %161 = math.tanh %160 : vector<8x30xf32>
    %162 = vector.extract_strided_slice %159 {offsets = [0, 0], sizes = [8, 30], strides = [1, 1]} : vector<8x90xf32> to vector<8x30xf32>
    %163 = vector.extract_strided_slice %159 {offsets = [0, 30], sizes = [8, 30], strides = [1, 1]} : vector<8x90xf32> to vector<8x30xf32>
    %164 = vector.extract_strided_slice %159 {offsets = [0, 60], sizes = [8, 30], strides = [1, 1]} : vector<8x90xf32> to vector<8x30xf32>
    %165 = arith.mulf %163, %153 : vector<8x30xf32>
    %166 = arith.mulf %162, %161 : vector<8x30xf32>
    %167 = arith.addf %165, %166 : vector<8x30xf32>
    %168 = math.tanh %167 : vector<8x30xf32>
    %169 = arith.mulf %164, %168 : vector<8x30xf32>
    %cst_34 = arith.constant dense<0.000000e+00> : vector<8x120xf32>
    %170 = tpu.matmul %169, %6, %cst_34 {dimension_numbers = #tpu.dot_dimension_numbers<[1], [0], [0], [1], [0, 0, 1, 1], [], []>} : vector<8x30xf32>, vector<30x120xf32>, vector<8x120xf32> -> vector<8x120xf32>
    %171 = arith.addf %170, %143 : vector<8x120xf32>
    %172 = vector.extract_strided_slice %171 {offsets = [0, 0], sizes = [8, 90], strides = [1, 1]} : vector<8x120xf32> to vector<8x90xf32>
    %173 = arith.negf %172 : vector<8x90xf32>
    %174 = math.exp %173 : vector<8x90xf32>
    %cst_35 = arith.constant 1.000000e+00 : f32
    %175 = vector.broadcast %cst_35 : f32 to vector<8x90xf32>
    %176 = arith.addf %175, %174 : vector<8x90xf32>
    %177 = arith.divf %175, %176 : vector<8x90xf32>
    %178 = vector.extract_strided_slice %171 {offsets = [0, 90], sizes = [8, 30], strides = [1, 1]} : vector<8x120xf32> to vector<8x30xf32>
    %179 = math.tanh %178 : vector<8x30xf32>
    %180 = vector.extract_strided_slice %177 {offsets = [0, 0], sizes = [8, 30], strides = [1, 1]} : vector<8x90xf32> to vector<8x30xf32>
    %181 = vector.extract_strided_slice %177 {offsets = [0, 30], sizes = [8, 30], strides = [1, 1]} : vector<8x90xf32> to vector<8x30xf32>
    %182 = vector.extract_strided_slice %177 {offsets = [0, 60], sizes = [8, 30], strides = [1, 1]} : vector<8x90xf32> to vector<8x30xf32>
    %183 = arith.mulf %181, %167 : vector<8x30xf32>
    %184 = arith.mulf %180, %179 : vector<8x30xf32>
    %185 = arith.addf %183, %184 : vector<8x30xf32>
    %186 = math.tanh %185 : vector<8x30xf32>
    %187 = arith.mulf %182, %186 : vector<8x30xf32>
    %cst_36 = arith.constant dense<0.000000e+00> : vector<8x120xf32>
    %188 = tpu.matmul %187, %6, %cst_36 {dimension_numbers = #tpu.dot_dimension_numbers<[1], [0], [0], [1], [0, 0, 1, 1], [], []>} : vector<8x30xf32>, vector<30x120xf32>, vector<8x120xf32> -> vector<8x120xf32>
    %189 = arith.addf %188, %146 : vector<8x120xf32>
    %190 = vector.extract_strided_slice %189 {offsets = [0, 0], sizes = [8, 90], strides = [1, 1]} : vector<8x120xf32> to vector<8x90xf32>
    %191 = arith.negf %190 : vector<8x90xf32>
    %192 = math.exp %191 : vector<8x90xf32>
    %cst_37 = arith.constant 1.000000e+00 : f32
    %193 = vector.broadcast %cst_37 : f32 to vector<8x90xf32>
    %194 = arith.addf %193, %192 : vector<8x90xf32>
    %195 = arith.divf %193, %194 : vector<8x90xf32>
    %196 = vector.extract_strided_slice %189 {offsets = [0, 90], sizes = [8, 30], strides = [1, 1]} : vector<8x120xf32> to vector<8x30xf32>
    %197 = math.tanh %196 : vector<8x30xf32>
    %198 = vector.extract_strided_slice %195 {offsets = [0, 0], sizes = [8, 30], strides = [1, 1]} : vector<8x90xf32> to vector<8x30xf32>
    %199 = vector.extract_strided_slice %195 {offsets = [0, 30], sizes = [8, 30], strides = [1, 1]} : vector<8x90xf32> to vector<8x30xf32>
    %200 = vector.extract_strided_slice %195 {offsets = [0, 60], sizes = [8, 30], strides = [1, 1]} : vector<8x90xf32> to vector<8x30xf32>
    %201 = arith.mulf %199, %185 : vector<8x30xf32>
    %202 = arith.mulf %198, %197 : vector<8x30xf32>
    %203 = arith.addf %201, %202 : vector<8x30xf32>
    %204 = math.tanh %203 : vector<8x30xf32>
    %205 = arith.mulf %200, %204 : vector<8x30xf32>
    %cst_38 = arith.constant dense<0.000000e+00> : vector<8x120xf32>
    %206 = tpu.matmul %205, %6, %cst_38 {dimension_numbers = #tpu.dot_dimension_numbers<[1], [0], [0], [1], [0, 0, 1, 1], [], []>} : vector<8x30xf32>, vector<30x120xf32>, vector<8x120xf32> -> vector<8x120xf32>
    %207 = arith.addf %206, %149 : vector<8x120xf32>
    %208 = vector.extract_strided_slice %207 {offsets = [0, 0], sizes = [8, 90], strides = [1, 1]} : vector<8x120xf32> to vector<8x90xf32>
    %209 = arith.negf %208 : vector<8x90xf32>
    %210 = math.exp %209 : vector<8x90xf32>
    %cst_39 = arith.constant 1.000000e+00 : f32
    %211 = vector.broadcast %cst_39 : f32 to vector<8x90xf32>
    %212 = arith.addf %211, %210 : vector<8x90xf32>
    %213 = arith.divf %211, %212 : vector<8x90xf32>
    %214 = vector.extract_strided_slice %207 {offsets = [0, 90], sizes = [8, 30], strides = [1, 1]} : vector<8x120xf32> to vector<8x30xf32>
    %215 = math.tanh %214 : vector<8x30xf32>
    %216 = vector.extract_strided_slice %213 {offsets = [0, 0], sizes = [8, 30], strides = [1, 1]} : vector<8x90xf32> to vector<8x30xf32>
    %217 = vector.extract_strided_slice %213 {offsets = [0, 30], sizes = [8, 30], strides = [1, 1]} : vector<8x90xf32> to vector<8x30xf32>
    %218 = vector.extract_strided_slice %213 {offsets = [0, 60], sizes = [8, 30], strides = [1, 1]} : vector<8x90xf32> to vector<8x30xf32>
    %219 = arith.mulf %217, %203 : vector<8x30xf32>
    %220 = arith.mulf %216, %215 : vector<8x30xf32>
    %221 = arith.addf %219, %220 : vector<8x30xf32>
    %222 = math.tanh %221 : vector<8x30xf32>
    %223 = arith.mulf %218, %222 : vector<8x30xf32>
    %cst_40 = arith.constant dense<0.000000e+00> : vector<8x120xf32>
    %224 = tpu.matmul %223, %6, %cst_40 {dimension_numbers = #tpu.dot_dimension_numbers<[1], [0], [0], [1], [0, 0, 1, 1], [], []>} : vector<8x30xf32>, vector<30x120xf32>, vector<8x120xf32> -> vector<8x120xf32>
    %225 = arith.addf %224, %152 : vector<8x120xf32>
    %226 = vector.extract_strided_slice %225 {offsets = [0, 0], sizes = [8, 90], strides = [1, 1]} : vector<8x120xf32> to vector<8x90xf32>
    %227 = arith.negf %226 : vector<8x90xf32>
    %228 = math.exp %227 : vector<8x90xf32>
    %cst_41 = arith.constant 1.000000e+00 : f32
    %229 = vector.broadcast %cst_41 : f32 to vector<8x90xf32>
    %230 = arith.addf %229, %228 : vector<8x90xf32>
    %231 = arith.divf %229, %230 : vector<8x90xf32>
    %232 = vector.extract_strided_slice %225 {offsets = [0, 90], sizes = [8, 30], strides = [1, 1]} : vector<8x120xf32> to vector<8x30xf32>
    %233 = math.tanh %232 : vector<8x30xf32>
    %234 = vector.extract_strided_slice %231 {offsets = [0, 0], sizes = [8, 30], strides = [1, 1]} : vector<8x90xf32> to vector<8x30xf32>
    %235 = vector.extract_strided_slice %231 {offsets = [0, 30], sizes = [8, 30], strides = [1, 1]} : vector<8x90xf32> to vector<8x30xf32>
    %236 = vector.extract_strided_slice %231 {offsets = [0, 60], sizes = [8, 30], strides = [1, 1]} : vector<8x90xf32> to vector<8x30xf32>
    %237 = arith.mulf %235, %221 : vector<8x30xf32>
    %238 = arith.mulf %234, %233 : vector<8x30xf32>
    %239 = arith.addf %237, %238 : vector<8x30xf32>
    %240 = math.tanh %239 : vector<8x30xf32>
    %241 = arith.mulf %236, %240 : vector<8x30xf32>
    %242 = vector.extract_strided_slice %169 {offsets = [0, 0], sizes = [8, 15], strides = [1, 1]} : vector<8x30xf32> to vector<8x15xf32>
    %243 = vector.extract_strided_slice %241 {offsets = [0, 15], sizes = [8, 15], strides = [1, 1]} : vector<8x30xf32> to vector<8x15xf32>
    %244 = arith.addf %242, %243 : vector<8x15xf32>
    %245 = vector.extract_strided_slice %187 {offsets = [0, 0], sizes = [8, 15], strides = [1, 1]} : vector<8x30xf32> to vector<8x15xf32>
    %246 = vector.extract_strided_slice %223 {offsets = [0, 15], sizes = [8, 15], strides = [1, 1]} : vector<8x30xf32> to vector<8x15xf32>
    %247 = arith.addf %245, %246 : vector<8x15xf32>
    %248 = vector.extract_strided_slice %205 {offsets = [0, 0], sizes = [8, 15], strides = [1, 1]} : vector<8x30xf32> to vector<8x15xf32>
    %249 = vector.extract_strided_slice %205 {offsets = [0, 15], sizes = [8, 15], strides = [1, 1]} : vector<8x30xf32> to vector<8x15xf32>
    %250 = arith.addf %248, %249 : vector<8x15xf32>
    %251 = vector.extract_strided_slice %223 {offsets = [0, 0], sizes = [8, 15], strides = [1, 1]} : vector<8x30xf32> to vector<8x15xf32>
    %252 = vector.extract_strided_slice %187 {offsets = [0, 15], sizes = [8, 15], strides = [1, 1]} : vector<8x30xf32> to vector<8x15xf32>
    %253 = arith.addf %251, %252 : vector<8x15xf32>
    %254 = vector.extract_strided_slice %241 {offsets = [0, 0], sizes = [8, 15], strides = [1, 1]} : vector<8x30xf32> to vector<8x15xf32>
    %255 = vector.extract_strided_slice %169 {offsets = [0, 15], sizes = [8, 15], strides = [1, 1]} : vector<8x30xf32> to vector<8x15xf32>
    %256 = arith.addf %254, %255 : vector<8x15xf32>
    %257 = tpu.concatenate %244, %247, %250, %253, %256 in 1 : vector<8x15xf32>, vector<8x15xf32>, vector<8x15xf32>, vector<8x15xf32>, vector<8x15xf32> -> vector<8x75xf32>
    %258 = vector.extract_strided_slice %127 {offsets = [0, 0], sizes = [8, 15], strides = [1, 1]} : vector<8x30xf32> to vector<8x15xf32>
    %259 = vector.extract_strided_slice %127 {offsets = [0, 15], sizes = [8, 15], strides = [1, 1]} : vector<8x30xf32> to vector<8x15xf32>
    %260 = arith.addf %258, %259 : vector<8x15xf32>
    %261 = vector.extract_strided_slice %125 {offsets = [0, 0], sizes = [8, 15], strides = [1, 1]} : vector<8x30xf32> to vector<8x15xf32>
    %262 = vector.extract_strided_slice %125 {offsets = [0, 15], sizes = [8, 15], strides = [1, 1]} : vector<8x30xf32> to vector<8x15xf32>
    %263 = arith.addf %261, %262 : vector<8x15xf32>
    %264 = vector.extract_strided_slice %241 {offsets = [0, 0], sizes = [8, 15], strides = [1, 1]} : vector<8x30xf32> to vector<8x15xf32>
    %265 = vector.extract_strided_slice %241 {offsets = [0, 15], sizes = [8, 15], strides = [1, 1]} : vector<8x30xf32> to vector<8x15xf32>
    %266 = arith.addf %264, %265 : vector<8x15xf32>
    %267 = vector.extract_strided_slice %239 {offsets = [0, 0], sizes = [8, 15], strides = [1, 1]} : vector<8x30xf32> to vector<8x15xf32>
    %268 = vector.extract_strided_slice %239 {offsets = [0, 15], sizes = [8, 15], strides = [1, 1]} : vector<8x30xf32> to vector<8x15xf32>
    %269 = arith.addf %267, %268 : vector<8x15xf32>
    %cst_42 = arith.constant dense<0.000000e+00> : vector<8x75xf32>
    %270 = tpu.matmul %257, %12, %cst_42 {dimension_numbers = #tpu.dot_dimension_numbers<[1], [0], [0], [1], [0, 0, 1, 1], [], []>} : vector<8x75xf32>, vector<75x75xf32>, vector<8x75xf32> -> vector<8x75xf32>
    %271 = vector.broadcast %14 : vector<1x75xf32> to vector<8x75xf32>
    %272 = arith.addf %270, %271 : vector<8x75xf32>
    %cst_43 = arith.constant dense<0.000000e+00> : vector<8x60xf32>
    %273 = tpu.matmul %260, %8, %cst_43 {dimension_numbers = #tpu.dot_dimension_numbers<[1], [0], [0], [1], [0, 0, 1, 1], [], []>} : vector<8x15xf32>, vector<15x60xf32>, vector<8x60xf32> -> vector<8x60xf32>
    %274 = vector.broadcast %11 : vector<1x60xf32> to vector<8x60xf32>
    %275 = arith.addf %273, %274 : vector<8x60xf32>
    %276 = vector.extract_strided_slice %275 {offsets = [0, 0], sizes = [8, 45], strides = [1, 1]} : vector<8x60xf32> to vector<8x45xf32>
    %277 = arith.negf %276 : vector<8x45xf32>
    %278 = math.exp %277 : vector<8x45xf32>
    %cst_44 = arith.constant 1.000000e+00 : f32
    %279 = vector.broadcast %cst_44 : f32 to vector<8x45xf32>
    %280 = arith.addf %279, %278 : vector<8x45xf32>
    %281 = arith.divf %279, %280 : vector<8x45xf32>
    %282 = vector.extract_strided_slice %275 {offsets = [0, 45], sizes = [8, 15], strides = [1, 1]} : vector<8x60xf32> to vector<8x15xf32>
    %283 = math.tanh %282 : vector<8x15xf32>
    %284 = vector.extract_strided_slice %281 {offsets = [0, 0], sizes = [8, 15], strides = [1, 1]} : vector<8x45xf32> to vector<8x15xf32>
    %285 = vector.extract_strided_slice %281 {offsets = [0, 15], sizes = [8, 15], strides = [1, 1]} : vector<8x45xf32> to vector<8x15xf32>
    %286 = vector.extract_strided_slice %281 {offsets = [0, 30], sizes = [8, 15], strides = [1, 1]} : vector<8x45xf32> to vector<8x15xf32>
    %287 = arith.mulf %285, %263 : vector<8x15xf32>
    %288 = arith.mulf %284, %283 : vector<8x15xf32>
    %289 = arith.addf %287, %288 : vector<8x15xf32>
    %290 = math.tanh %289 : vector<8x15xf32>
    %291 = arith.mulf %286, %290 : vector<8x15xf32>
    %292 = tpu.concatenate %291, %266 in 1 : vector<8x15xf32>, vector<8x15xf32> -> vector<8x30xf32>
    %cst_45 = arith.constant dense<0.000000e+00> : vector<8x60xf32>
    %293 = tpu.matmul %292, %9, %cst_45 {dimension_numbers = #tpu.dot_dimension_numbers<[1], [0], [0], [1], [0, 0, 1, 1], [], []>} : vector<8x30xf32>, vector<30x60xf32>, vector<8x60xf32> -> vector<8x60xf32>
    %294 = vector.broadcast %10 : vector<1x60xf32> to vector<8x60xf32>
    %295 = arith.addf %293, %294 : vector<8x60xf32>
    %296 = vector.extract_strided_slice %295 {offsets = [0, 0], sizes = [8, 45], strides = [1, 1]} : vector<8x60xf32> to vector<8x45xf32>
    %297 = arith.negf %296 : vector<8x45xf32>
    %298 = math.exp %297 : vector<8x45xf32>
    %cst_46 = arith.constant 1.000000e+00 : f32
    %299 = vector.broadcast %cst_46 : f32 to vector<8x45xf32>
    %300 = arith.addf %299, %298 : vector<8x45xf32>
    %301 = arith.divf %299, %300 : vector<8x45xf32>
    %302 = vector.extract_strided_slice %295 {offsets = [0, 45], sizes = [8, 15], strides = [1, 1]} : vector<8x60xf32> to vector<8x15xf32>
    %303 = math.tanh %302 : vector<8x15xf32>
    %304 = vector.extract_strided_slice %301 {offsets = [0, 0], sizes = [8, 15], strides = [1, 1]} : vector<8x45xf32> to vector<8x15xf32>
    %305 = vector.extract_strided_slice %301 {offsets = [0, 15], sizes = [8, 15], strides = [1, 1]} : vector<8x45xf32> to vector<8x15xf32>
    %306 = vector.extract_strided_slice %301 {offsets = [0, 30], sizes = [8, 15], strides = [1, 1]} : vector<8x45xf32> to vector<8x15xf32>
    %307 = arith.mulf %305, %269 : vector<8x15xf32>
    %308 = arith.mulf %304, %303 : vector<8x15xf32>
    %309 = arith.addf %307, %308 : vector<8x15xf32>
    %310 = math.tanh %309 : vector<8x15xf32>
    %311 = arith.mulf %306, %310 : vector<8x15xf32>
    %cst_47 = arith.constant dense<0.000000e+00> : vector<8x75xf32>
    %312 = tpu.matmul %311, %13, %cst_47 {dimension_numbers = #tpu.dot_dimension_numbers<[1], [0], [0], [1], [0, 0, 1, 1], [], []>} : vector<8x15xf32>, vector<15x75xf32>, vector<8x75xf32> -> vector<8x75xf32>
    %313 = arith.addf %272, %312 : vector<8x75xf32>
    %314 = math.tanh %313 : vector<8x75xf32>
    %cst_48 = arith.constant dense<0.000000e+00> : vector<8x5xf32>
    %315 = tpu.matmul %314, %15, %cst_48 {dimension_numbers = #tpu.dot_dimension_numbers<[1], [0], [0], [1], [0, 0, 1, 1], [], []>} : vector<8x75xf32>, vector<75x5xf32>, vector<8x5xf32> -> vector<8x5xf32>
    %cst_49 = arith.constant dense<0xFF800000> : vector<8xf32>
    %316 = vector.multi_reduction <maximumf>, %315, %cst_49 [1] : vector<8x5xf32> to vector<8xf32>
    %317 = vector.shape_cast %316 : vector<8xf32> to vector<8x1xf32>
    %318 = vector.broadcast %317 : vector<8x1xf32> to vector<8x5xf32>
    %319 = arith.subf %315, %318 : vector<8x5xf32>
    %320 = math.exp %319 : vector<8x5xf32>
    %cst_50 = arith.constant dense<0.000000e+00> : vector<8xf32>
    %321 = vector.multi_reduction <add>, %320, %cst_50 [1] : vector<8x5xf32> to vector<8xf32>
    %322 = vector.shape_cast %321 : vector<8xf32> to vector<8x1xf32>
    %323 = vector.broadcast %322 : vector<8x1xf32> to vector<8x5xf32>
    %324 = arith.divf %320, %323 : vector<8x5xf32>
    %cst_51 = arith.constant dense<0.000000e+00> : vector<8x60xf32>
    %325 = tpu.matmul %291, %8, %cst_51 {dimension_numbers = #tpu.dot_dimension_numbers<[1], [0], [0], [1], [0, 0, 1, 1], [], []>} : vector<8x15xf32>, vector<15x60xf32>, vector<8x60xf32> -> vector<8x60xf32>
    %326 = vector.broadcast %11 : vector<1x60xf32> to vector<8x60xf32>
    %327 = arith.addf %325, %326 : vector<8x60xf32>
    %328 = vector.extract_strided_slice %327 {offsets = [0, 0], sizes = [8, 45], strides = [1, 1]} : vector<8x60xf32> to vector<8x45xf32>
    %329 = arith.negf %328 : vector<8x45xf32>
    %330 = math.exp %329 : vector<8x45xf32>
    %cst_52 = arith.constant 1.000000e+00 : f32
    %331 = vector.broadcast %cst_52 : f32 to vector<8x45xf32>
    %332 = arith.addf %331, %330 : vector<8x45xf32>
    %333 = arith.divf %331, %332 : vector<8x45xf32>
    %334 = vector.extract_strided_slice %327 {offsets = [0, 45], sizes = [8, 15], strides = [1, 1]} : vector<8x60xf32> to vector<8x15xf32>
    %335 = math.tanh %334 : vector<8x15xf32>
    %336 = vector.extract_strided_slice %333 {offsets = [0, 0], sizes = [8, 15], strides = [1, 1]} : vector<8x45xf32> to vector<8x15xf32>
    %337 = vector.extract_strided_slice %333 {offsets = [0, 15], sizes = [8, 15], strides = [1, 1]} : vector<8x45xf32> to vector<8x15xf32>
    %338 = vector.extract_strided_slice %333 {offsets = [0, 30], sizes = [8, 15], strides = [1, 1]} : vector<8x45xf32> to vector<8x15xf32>
    %339 = arith.mulf %337, %289 : vector<8x15xf32>
    %340 = arith.mulf %336, %335 : vector<8x15xf32>
    %341 = arith.addf %339, %340 : vector<8x15xf32>
    %342 = math.tanh %341 : vector<8x15xf32>
    %343 = arith.mulf %338, %342 : vector<8x15xf32>
    %344 = tpu.concatenate %343, %311 in 1 : vector<8x15xf32>, vector<8x15xf32> -> vector<8x30xf32>
    %cst_53 = arith.constant dense<0.000000e+00> : vector<8x60xf32>
    %345 = tpu.matmul %344, %9, %cst_53 {dimension_numbers = #tpu.dot_dimension_numbers<[1], [0], [0], [1], [0, 0, 1, 1], [], []>} : vector<8x30xf32>, vector<30x60xf32>, vector<8x60xf32> -> vector<8x60xf32>
    %346 = vector.broadcast %10 : vector<1x60xf32> to vector<8x60xf32>
    %347 = arith.addf %345, %346 : vector<8x60xf32>
    %348 = vector.extract_strided_slice %347 {offsets = [0, 0], sizes = [8, 45], strides = [1, 1]} : vector<8x60xf32> to vector<8x45xf32>
    %349 = arith.negf %348 : vector<8x45xf32>
    %350 = math.exp %349 : vector<8x45xf32>
    %cst_54 = arith.constant 1.000000e+00 : f32
    %351 = vector.broadcast %cst_54 : f32 to vector<8x45xf32>
    %352 = arith.addf %351, %350 : vector<8x45xf32>
    %353 = arith.divf %351, %352 : vector<8x45xf32>
    %354 = vector.extract_strided_slice %347 {offsets = [0, 45], sizes = [8, 15], strides = [1, 1]} : vector<8x60xf32> to vector<8x15xf32>
    %355 = math.tanh %354 : vector<8x15xf32>
    %356 = vector.extract_strided_slice %353 {offsets = [0, 0], sizes = [8, 15], strides = [1, 1]} : vector<8x45xf32> to vector<8x15xf32>
    %357 = vector.extract_strided_slice %353 {offsets = [0, 15], sizes = [8, 15], strides = [1, 1]} : vector<8x45xf32> to vector<8x15xf32>
    %358 = vector.extract_strided_slice %353 {offsets = [0, 30], sizes = [8, 15], strides = [1, 1]} : vector<8x45xf32> to vector<8x15xf32>
    %359 = arith.mulf %357, %309 : vector<8x15xf32>
    %360 = arith.mulf %356, %355 : vector<8x15xf32>
    %361 = arith.addf %359, %360 : vector<8x15xf32>
    %362 = math.tanh %361 : vector<8x15xf32>
    %363 = arith.mulf %358, %362 : vector<8x15xf32>
    %cst_55 = arith.constant dense<0.000000e+00> : vector<8x75xf32>
    %364 = tpu.matmul %363, %13, %cst_55 {dimension_numbers = #tpu.dot_dimension_numbers<[1], [0], [0], [1], [0, 0, 1, 1], [], []>} : vector<8x15xf32>, vector<15x75xf32>, vector<8x75xf32> -> vector<8x75xf32>
    %365 = arith.addf %272, %364 : vector<8x75xf32>
    %366 = math.tanh %365 : vector<8x75xf32>
    %cst_56 = arith.constant dense<0.000000e+00> : vector<8x5xf32>
    %367 = tpu.matmul %366, %15, %cst_56 {dimension_numbers = #tpu.dot_dimension_numbers<[1], [0], [0], [1], [0, 0, 1, 1], [], []>} : vector<8x75xf32>, vector<75x5xf32>, vector<8x5xf32> -> vector<8x5xf32>
    %cst_57 = arith.constant dense<0xFF800000> : vector<8xf32>
    %368 = vector.multi_reduction <maximumf>, %367, %cst_57 [1] : vector<8x5xf32> to vector<8xf32>
    %369 = vector.shape_cast %368 : vector<8xf32> to vector<8x1xf32>
    %370 = vector.broadcast %369 : vector<8x1xf32> to vector<8x5xf32>
    %371 = arith.subf %367, %370 : vector<8x5xf32>
    %372 = math.exp %371 : vector<8x5xf32>
    %cst_58 = arith.constant dense<0.000000e+00> : vector<8xf32>
    %373 = vector.multi_reduction <add>, %372, %cst_58 [1] : vector<8x5xf32> to vector<8xf32>
    %374 = vector.shape_cast %373 : vector<8xf32> to vector<8x1xf32>
    %375 = vector.broadcast %374 : vector<8x1xf32> to vector<8x5xf32>
    %376 = arith.divf %372, %375 : vector<8x5xf32>
    %cst_59 = arith.constant dense<0.000000e+00> : vector<8x60xf32>
    %377 = tpu.matmul %343, %8, %cst_59 {dimension_numbers = #tpu.dot_dimension_numbers<[1], [0], [0], [1], [0, 0, 1, 1], [], []>} : vector<8x15xf32>, vector<15x60xf32>, vector<8x60xf32> -> vector<8x60xf32>
    %378 = vector.broadcast %11 : vector<1x60xf32> to vector<8x60xf32>
    %379 = arith.addf %377, %378 : vector<8x60xf32>
    %380 = vector.extract_strided_slice %379 {offsets = [0, 0], sizes = [8, 45], strides = [1, 1]} : vector<8x60xf32> to vector<8x45xf32>
    %381 = arith.negf %380 : vector<8x45xf32>
    %382 = math.exp %381 : vector<8x45xf32>
    %cst_60 = arith.constant 1.000000e+00 : f32
    %383 = vector.broadcast %cst_60 : f32 to vector<8x45xf32>
    %384 = arith.addf %383, %382 : vector<8x45xf32>
    %385 = arith.divf %383, %384 : vector<8x45xf32>
    %386 = vector.extract_strided_slice %379 {offsets = [0, 45], sizes = [8, 15], strides = [1, 1]} : vector<8x60xf32> to vector<8x15xf32>
    %387 = math.tanh %386 : vector<8x15xf32>
    %388 = vector.extract_strided_slice %385 {offsets = [0, 0], sizes = [8, 15], strides = [1, 1]} : vector<8x45xf32> to vector<8x15xf32>
    %389 = vector.extract_strided_slice %385 {offsets = [0, 15], sizes = [8, 15], strides = [1, 1]} : vector<8x45xf32> to vector<8x15xf32>
    %390 = vector.extract_strided_slice %385 {offsets = [0, 30], sizes = [8, 15], strides = [1, 1]} : vector<8x45xf32> to vector<8x15xf32>
    %391 = arith.mulf %389, %341 : vector<8x15xf32>
    %392 = arith.mulf %388, %387 : vector<8x15xf32>
    %393 = arith.addf %391, %392 : vector<8x15xf32>
    %394 = math.tanh %393 : vector<8x15xf32>
    %395 = arith.mulf %390, %394 : vector<8x15xf32>
    %396 = tpu.concatenate %395, %363 in 1 : vector<8x15xf32>, vector<8x15xf32> -> vector<8x30xf32>
    %cst_61 = arith.constant dense<0.000000e+00> : vector<8x60xf32>
    %397 = tpu.matmul %396, %9, %cst_61 {dimension_numbers = #tpu.dot_dimension_numbers<[1], [0], [0], [1], [0, 0, 1, 1], [], []>} : vector<8x30xf32>, vector<30x60xf32>, vector<8x60xf32> -> vector<8x60xf32>
    %398 = vector.broadcast %10 : vector<1x60xf32> to vector<8x60xf32>
    %399 = arith.addf %397, %398 : vector<8x60xf32>
    %400 = vector.extract_strided_slice %399 {offsets = [0, 0], sizes = [8, 45], strides = [1, 1]} : vector<8x60xf32> to vector<8x45xf32>
    %401 = arith.negf %400 : vector<8x45xf32>
    %402 = math.exp %401 : vector<8x45xf32>
    %cst_62 = arith.constant 1.000000e+00 : f32
    %403 = vector.broadcast %cst_62 : f32 to vector<8x45xf32>
    %404 = arith.addf %403, %402 : vector<8x45xf32>
    %405 = arith.divf %403, %404 : vector<8x45xf32>
    %406 = vector.extract_strided_slice %399 {offsets = [0, 45], sizes = [8, 15], strides = [1, 1]} : vector<8x60xf32> to vector<8x15xf32>
    %407 = math.tanh %406 : vector<8x15xf32>
    %408 = vector.extract_strided_slice %405 {offsets = [0, 0], sizes = [8, 15], strides = [1, 1]} : vector<8x45xf32> to vector<8x15xf32>
    %409 = vector.extract_strided_slice %405 {offsets = [0, 15], sizes = [8, 15], strides = [1, 1]} : vector<8x45xf32> to vector<8x15xf32>
    %410 = vector.extract_strided_slice %405 {offsets = [0, 30], sizes = [8, 15], strides = [1, 1]} : vector<8x45xf32> to vector<8x15xf32>
    %411 = arith.mulf %409, %361 : vector<8x15xf32>
    %412 = arith.mulf %408, %407 : vector<8x15xf32>
    %413 = arith.addf %411, %412 : vector<8x15xf32>
    %414 = math.tanh %413 : vector<8x15xf32>
    %415 = arith.mulf %410, %414 : vector<8x15xf32>
    %cst_63 = arith.constant dense<0.000000e+00> : vector<8x75xf32>
    %416 = tpu.matmul %415, %13, %cst_63 {dimension_numbers = #tpu.dot_dimension_numbers<[1], [0], [0], [1], [0, 0, 1, 1], [], []>} : vector<8x15xf32>, vector<15x75xf32>, vector<8x75xf32> -> vector<8x75xf32>
    %417 = arith.addf %272, %416 : vector<8x75xf32>
    %418 = math.tanh %417 : vector<8x75xf32>
    %cst_64 = arith.constant dense<0.000000e+00> : vector<8x5xf32>
    %419 = tpu.matmul %418, %15, %cst_64 {dimension_numbers = #tpu.dot_dimension_numbers<[1], [0], [0], [1], [0, 0, 1, 1], [], []>} : vector<8x75xf32>, vector<75x5xf32>, vector<8x5xf32> -> vector<8x5xf32>
    %cst_65 = arith.constant dense<0xFF800000> : vector<8xf32>
    %420 = vector.multi_reduction <maximumf>, %419, %cst_65 [1] : vector<8x5xf32> to vector<8xf32>
    %421 = vector.shape_cast %420 : vector<8xf32> to vector<8x1xf32>
    %422 = vector.broadcast %421 : vector<8x1xf32> to vector<8x5xf32>
    %423 = arith.subf %419, %422 : vector<8x5xf32>
    %424 = math.exp %423 : vector<8x5xf32>
    %cst_66 = arith.constant dense<0.000000e+00> : vector<8xf32>
    %425 = vector.multi_reduction <add>, %424, %cst_66 [1] : vector<8x5xf32> to vector<8xf32>
    %426 = vector.shape_cast %425 : vector<8xf32> to vector<8x1xf32>
    %427 = vector.broadcast %426 : vector<8x1xf32> to vector<8x5xf32>
    %428 = arith.divf %424, %427 : vector<8x5xf32>
    %cst_67 = arith.constant dense<0.000000e+00> : vector<8x60xf32>
    %429 = tpu.matmul %395, %8, %cst_67 {dimension_numbers = #tpu.dot_dimension_numbers<[1], [0], [0], [1], [0, 0, 1, 1], [], []>} : vector<8x15xf32>, vector<15x60xf32>, vector<8x60xf32> -> vector<8x60xf32>
    %430 = vector.broadcast %11 : vector<1x60xf32> to vector<8x60xf32>
    %431 = arith.addf %429, %430 : vector<8x60xf32>
    %432 = vector.extract_strided_slice %431 {offsets = [0, 0], sizes = [8, 45], strides = [1, 1]} : vector<8x60xf32> to vector<8x45xf32>
    %433 = arith.negf %432 : vector<8x45xf32>
    %434 = math.exp %433 : vector<8x45xf32>
    %cst_68 = arith.constant 1.000000e+00 : f32
    %435 = vector.broadcast %cst_68 : f32 to vector<8x45xf32>
    %436 = arith.addf %435, %434 : vector<8x45xf32>
    %437 = arith.divf %435, %436 : vector<8x45xf32>
    %438 = vector.extract_strided_slice %431 {offsets = [0, 45], sizes = [8, 15], strides = [1, 1]} : vector<8x60xf32> to vector<8x15xf32>
    %439 = math.tanh %438 : vector<8x15xf32>
    %440 = vector.extract_strided_slice %437 {offsets = [0, 0], sizes = [8, 15], strides = [1, 1]} : vector<8x45xf32> to vector<8x15xf32>
    %441 = vector.extract_strided_slice %437 {offsets = [0, 15], sizes = [8, 15], strides = [1, 1]} : vector<8x45xf32> to vector<8x15xf32>
    %442 = vector.extract_strided_slice %437 {offsets = [0, 30], sizes = [8, 15], strides = [1, 1]} : vector<8x45xf32> to vector<8x15xf32>
    %443 = arith.mulf %441, %393 : vector<8x15xf32>
    %444 = arith.mulf %440, %439 : vector<8x15xf32>
    %445 = arith.addf %443, %444 : vector<8x15xf32>
    %446 = math.tanh %445 : vector<8x15xf32>
    %447 = arith.mulf %442, %446 : vector<8x15xf32>
    %448 = tpu.concatenate %447, %415 in 1 : vector<8x15xf32>, vector<8x15xf32> -> vector<8x30xf32>
    %cst_69 = arith.constant dense<0.000000e+00> : vector<8x60xf32>
    %449 = tpu.matmul %448, %9, %cst_69 {dimension_numbers = #tpu.dot_dimension_numbers<[1], [0], [0], [1], [0, 0, 1, 1], [], []>} : vector<8x30xf32>, vector<30x60xf32>, vector<8x60xf32> -> vector<8x60xf32>
    %450 = vector.broadcast %10 : vector<1x60xf32> to vector<8x60xf32>
    %451 = arith.addf %449, %450 : vector<8x60xf32>
    %452 = vector.extract_strided_slice %451 {offsets = [0, 0], sizes = [8, 45], strides = [1, 1]} : vector<8x60xf32> to vector<8x45xf32>
    %453 = arith.negf %452 : vector<8x45xf32>
    %454 = math.exp %453 : vector<8x45xf32>
    %cst_70 = arith.constant 1.000000e+00 : f32
    %455 = vector.broadcast %cst_70 : f32 to vector<8x45xf32>
    %456 = arith.addf %455, %454 : vector<8x45xf32>
    %457 = arith.divf %455, %456 : vector<8x45xf32>
    %458 = vector.extract_strided_slice %451 {offsets = [0, 45], sizes = [8, 15], strides = [1, 1]} : vector<8x60xf32> to vector<8x15xf32>
    %459 = math.tanh %458 : vector<8x15xf32>
    %460 = vector.extract_strided_slice %457 {offsets = [0, 0], sizes = [8, 15], strides = [1, 1]} : vector<8x45xf32> to vector<8x15xf32>
    %461 = vector.extract_strided_slice %457 {offsets = [0, 15], sizes = [8, 15], strides = [1, 1]} : vector<8x45xf32> to vector<8x15xf32>
    %462 = vector.extract_strided_slice %457 {offsets = [0, 30], sizes = [8, 15], strides = [1, 1]} : vector<8x45xf32> to vector<8x15xf32>
    %463 = arith.mulf %461, %413 : vector<8x15xf32>
    %464 = arith.mulf %460, %459 : vector<8x15xf32>
    %465 = arith.addf %463, %464 : vector<8x15xf32>
    %466 = math.tanh %465 : vector<8x15xf32>
    %467 = arith.mulf %462, %466 : vector<8x15xf32>
    %cst_71 = arith.constant dense<0.000000e+00> : vector<8x75xf32>
    %468 = tpu.matmul %467, %13, %cst_71 {dimension_numbers = #tpu.dot_dimension_numbers<[1], [0], [0], [1], [0, 0, 1, 1], [], []>} : vector<8x15xf32>, vector<15x75xf32>, vector<8x75xf32> -> vector<8x75xf32>
    %469 = arith.addf %272, %468 : vector<8x75xf32>
    %470 = math.tanh %469 : vector<8x75xf32>
    %cst_72 = arith.constant dense<0.000000e+00> : vector<8x5xf32>
    %471 = tpu.matmul %470, %15, %cst_72 {dimension_numbers = #tpu.dot_dimension_numbers<[1], [0], [0], [1], [0, 0, 1, 1], [], []>} : vector<8x75xf32>, vector<75x5xf32>, vector<8x5xf32> -> vector<8x5xf32>
    %cst_73 = arith.constant dense<0xFF800000> : vector<8xf32>
    %472 = vector.multi_reduction <maximumf>, %471, %cst_73 [1] : vector<8x5xf32> to vector<8xf32>
    %473 = vector.shape_cast %472 : vector<8xf32> to vector<8x1xf32>
    %474 = vector.broadcast %473 : vector<8x1xf32> to vector<8x5xf32>
    %475 = arith.subf %471, %474 : vector<8x5xf32>
    %476 = math.exp %475 : vector<8x5xf32>
    %cst_74 = arith.constant dense<0.000000e+00> : vector<8xf32>
    %477 = vector.multi_reduction <add>, %476, %cst_74 [1] : vector<8x5xf32> to vector<8xf32>
    %478 = vector.shape_cast %477 : vector<8xf32> to vector<8x1xf32>
    %479 = vector.broadcast %478 : vector<8x1xf32> to vector<8x5xf32>
    %480 = arith.divf %476, %479 : vector<8x5xf32>
    %cst_75 = arith.constant dense<0.000000e+00> : vector<8x60xf32>
    %481 = tpu.matmul %447, %8, %cst_75 {dimension_numbers = #tpu.dot_dimension_numbers<[1], [0], [0], [1], [0, 0, 1, 1], [], []>} : vector<8x15xf32>, vector<15x60xf32>, vector<8x60xf32> -> vector<8x60xf32>
    %482 = vector.broadcast %11 : vector<1x60xf32> to vector<8x60xf32>
    %483 = arith.addf %481, %482 : vector<8x60xf32>
    %484 = vector.extract_strided_slice %483 {offsets = [0, 0], sizes = [8, 45], strides = [1, 1]} : vector<8x60xf32> to vector<8x45xf32>
    %485 = arith.negf %484 : vector<8x45xf32>
    %486 = math.exp %485 : vector<8x45xf32>
    %cst_76 = arith.constant 1.000000e+00 : f32
    %487 = vector.broadcast %cst_76 : f32 to vector<8x45xf32>
    %488 = arith.addf %487, %486 : vector<8x45xf32>
    %489 = arith.divf %487, %488 : vector<8x45xf32>
    %490 = vector.extract_strided_slice %483 {offsets = [0, 45], sizes = [8, 15], strides = [1, 1]} : vector<8x60xf32> to vector<8x15xf32>
    %491 = math.tanh %490 : vector<8x15xf32>
    %492 = vector.extract_strided_slice %489 {offsets = [0, 0], sizes = [8, 15], strides = [1, 1]} : vector<8x45xf32> to vector<8x15xf32>
    %493 = vector.extract_strided_slice %489 {offsets = [0, 15], sizes = [8, 15], strides = [1, 1]} : vector<8x45xf32> to vector<8x15xf32>
    %494 = vector.extract_strided_slice %489 {offsets = [0, 30], sizes = [8, 15], strides = [1, 1]} : vector<8x45xf32> to vector<8x15xf32>
    %495 = arith.mulf %493, %445 : vector<8x15xf32>
    %496 = arith.mulf %492, %491 : vector<8x15xf32>
    %497 = arith.addf %495, %496 : vector<8x15xf32>
    %498 = math.tanh %497 : vector<8x15xf32>
    %499 = arith.mulf %494, %498 : vector<8x15xf32>
    %500 = tpu.concatenate %499, %467 in 1 : vector<8x15xf32>, vector<8x15xf32> -> vector<8x30xf32>
    %cst_77 = arith.constant dense<0.000000e+00> : vector<8x60xf32>
    %501 = tpu.matmul %500, %9, %cst_77 {dimension_numbers = #tpu.dot_dimension_numbers<[1], [0], [0], [1], [0, 0, 1, 1], [], []>} : vector<8x30xf32>, vector<30x60xf32>, vector<8x60xf32> -> vector<8x60xf32>
    %502 = vector.broadcast %10 : vector<1x60xf32> to vector<8x60xf32>
    %503 = arith.addf %501, %502 : vector<8x60xf32>
    %504 = vector.extract_strided_slice %503 {offsets = [0, 0], sizes = [8, 45], strides = [1, 1]} : vector<8x60xf32> to vector<8x45xf32>
    %505 = arith.negf %504 : vector<8x45xf32>
    %506 = math.exp %505 : vector<8x45xf32>
    %cst_78 = arith.constant 1.000000e+00 : f32
    %507 = vector.broadcast %cst_78 : f32 to vector<8x45xf32>
    %508 = arith.addf %507, %506 : vector<8x45xf32>
    %509 = arith.divf %507, %508 : vector<8x45xf32>
    %510 = vector.extract_strided_slice %503 {offsets = [0, 45], sizes = [8, 15], strides = [1, 1]} : vector<8x60xf32> to vector<8x15xf32>
    %511 = math.tanh %510 : vector<8x15xf32>
    %512 = vector.extract_strided_slice %509 {offsets = [0, 0], sizes = [8, 15], strides = [1, 1]} : vector<8x45xf32> to vector<8x15xf32>
    %513 = vector.extract_strided_slice %509 {offsets = [0, 15], sizes = [8, 15], strides = [1, 1]} : vector<8x45xf32> to vector<8x15xf32>
    %514 = vector.extract_strided_slice %509 {offsets = [0, 30], sizes = [8, 15], strides = [1, 1]} : vector<8x45xf32> to vector<8x15xf32>
    %515 = arith.mulf %513, %465 : vector<8x15xf32>
    %516 = arith.mulf %512, %511 : vector<8x15xf32>
    %517 = arith.addf %515, %516 : vector<8x15xf32>
    %518 = math.tanh %517 : vector<8x15xf32>
    %519 = arith.mulf %514, %518 : vector<8x15xf32>
    %cst_79 = arith.constant dense<0.000000e+00> : vector<8x75xf32>
    %520 = tpu.matmul %519, %13, %cst_79 {dimension_numbers = #tpu.dot_dimension_numbers<[1], [0], [0], [1], [0, 0, 1, 1], [], []>} : vector<8x15xf32>, vector<15x75xf32>, vector<8x75xf32> -> vector<8x75xf32>
    %521 = arith.addf %272, %520 : vector<8x75xf32>
    %522 = math.tanh %521 : vector<8x75xf32>
    %cst_80 = arith.constant dense<0.000000e+00> : vector<8x5xf32>
    %523 = tpu.matmul %522, %15, %cst_80 {dimension_numbers = #tpu.dot_dimension_numbers<[1], [0], [0], [1], [0, 0, 1, 1], [], []>} : vector<8x75xf32>, vector<75x5xf32>, vector<8x5xf32> -> vector<8x5xf32>
    %cst_81 = arith.constant dense<0xFF800000> : vector<8xf32>
    %524 = vector.multi_reduction <maximumf>, %523, %cst_81 [1] : vector<8x5xf32> to vector<8xf32>
    %525 = vector.shape_cast %524 : vector<8xf32> to vector<8x1xf32>
    %526 = vector.broadcast %525 : vector<8x1xf32> to vector<8x5xf32>
    %527 = arith.subf %523, %526 : vector<8x5xf32>
    %528 = math.exp %527 : vector<8x5xf32>
    %cst_82 = arith.constant dense<0.000000e+00> : vector<8xf32>
    %529 = vector.multi_reduction <add>, %528, %cst_82 [1] : vector<8x5xf32> to vector<8xf32>
    %530 = vector.shape_cast %529 : vector<8xf32> to vector<8x1xf32>
    %531 = vector.broadcast %530 : vector<8x1xf32> to vector<8x5xf32>
    %532 = arith.divf %528, %531 : vector<8x5xf32>
    %533 = tpu.concatenate %324, %376, %428, %480, %532 in 1 : vector<8x5xf32>, vector<8x5xf32>, vector<8x5xf32>, vector<8x5xf32>, vector<8x5xf32> -> vector<8x25xf32>
    %c0_83 = arith.constant 0 : index
    %c0_84 = arith.constant 0 : index
    %534 = vector.load %arg4[%c0_83, %c0_84] : memref<8x25xf32, #tpu.memory_space<vmem>>, vector<8x25xf32>
    tpu.vector_store %arg4[%c0_83, %c0_84], %533 {strides = array<i32>} : memref<8x25xf32, #tpu.memory_space<vmem>>, vector<8x25xf32>,
    return
  }
  func.func @transform_0(%arg0: i32) -> (i32, i32) {
    %c0_i32 = arith.constant 0 : i32
    %c0_i32_0 = arith.constant 0 : i32
    return %arg0, %c0_i32 : i32, i32
  }
  func.func @transform_1(%arg0: i32) -> (i32, i32) {
    %c0_i32 = arith.constant 0 : i32
    %c0_i32_0 = arith.constant 0 : i32
    %c0_i32_1 = arith.constant 0 : i32
    return %c0_i32, %c0_i32_0 : i32, i32
  }
  func.func @transform_2(%arg0: i32) -> (i32, i32) {
    %c0_i32 = arith.constant 0 : i32
    %c0_i32_0 = arith.constant 0 : i32
    %c0_i32_1 = arith.constant 0 : i32
    return %c0_i32, %c0_i32_0 : i32, i32
  }
  func.func @transform_3(%arg0: i32) -> (i32, i32) {
    %c0_i32 = arith.constant 0 : i32
    %c0_i32_0 = arith.constant 0 : i32
    return %arg0, %c0_i32 : i32, i32
  }
}

</mosaic_0001>

<bundles_post_ra>
// kernel: tpu_custom_call.1
= control target key start
LH: loop header
LB: loop body
LE: loop exit
PB: predicated region body
PF: predicated region fallthrough
CT: control target
= control target key end

     0   :  { %vm94_vm0 = vcmask 1044480   ;;  %v4618_v2 = vmov 0.0   ;;  %vm4619_vm1 = vmmov 0   ;;  %vm78_vm2 = vcmask 39936   ;;  %s5476_s0 = inlined_call_operand.vmem [shape: f32[40,5], index: 0, kind: input, shape index: {}]   ;;  %s5477_s1 = inlined_call_operand.vmem [shape: f32[179,120], index: 1, kind: input, shape index: {}]   ;;  %s5478_s2 = inlined_call_operand.vmem [shape: f32[166,75], index: 2, kind: input, shape index: {}]   ;;  %s5479_s3 = inlined_call_operand.hbm [shape: f32[8,25], index: 3, kind: output, shape index: {}]  }
   0x1   :  { %v15_v0 = vld [vmem:[%s5477_s1] sm:$0x1f]  ;;  %3672 = vmatprep.subr.mxu0 %v4618_v2  ;;  %3674 = vmatprep.mubr.msk.f32.mxu0 %vm4619_vm1, %v4618_v2  ;;  %v16_v3 = vld [vmem:[%s5477_s1 + $0x5] sm:$0x1f] }
   0x2   :  { %v66_v1 = vld [vmem:[%s5476_s0] sm:$0xff]  ;;  %3673 = vmatpush3.msk.msra.mxu0 %vm94_vm0, %v15_v0  ;;  %4344 = vmatprep.subr.mxu1 %v4618_v2 }
   0x3   :  { %3675 = vmatmul.mubr.msk.f32.vlgmr.msra.gmra.mrb[0].mxu0 %vm78_vm2, %v66_v1  ;;  %3689 = vmatprep.subr.mxu0 %v4618_v2 }
   0x4   :  { %8 = vsyncpa [#allocation3], 0  ;;  %3690 = vmatpush3.msk.msra.mxu0 %vm94_vm0, %v16_v3  ;;  %3677 = vmatprep.mubr.msk.f32.mxu0 %vm4619_vm1, %v4618_v2  ;;  %v67_v4 = vld [vmem:[%s5476_s0 + $0x8] sm:$0xff]  ;;  %v68_v5 = vld [vmem:[%s5476_s0 + $0x10] sm:$0xff]  ;;  %s4620_s27 = smov 38   ;;  %s4621_s28 = smov 30  }
   0x5   :  { %4345 = vmatpush3.msk.msra.mxu1 %vm94_vm0, %v15_v0  ;;  %3680 = vmatprep.mubr.msk.f32.mxu1 %vm4619_vm1, %v4618_v2  ;;  %v69_v6 = vld [vmem:[%s5476_s0 + $0x18] sm:$0xff]  ;;  %v70_v7 = vld [vmem:[%s5476_s0 + $0x20] sm:$0xff]  ;;  %v4717_v8 = vld [vmem:[%s5477_s1 + $0x28] ss:$0 sm:$0xff]  ;;  %v4622_v25 = vmov 0.0|0.0   ;;  %vm316_vm3 = vcmask 1045504  }
   0x6   :  { %3681 = vmatmul.mubr.msk.f32.vlgmr.msra.gmra.mrb[0].mxu1 %vm78_vm2, %v68_v5  ;;  %v17_v22 = vld [vmem:[%s5477_s1 + $0xa] sm:$0xff]  ;;  %v18_v23 = vld [vmem:[%s5477_s1 + $0x12] sm:$0xff]  ;;  %v19_v24 = vld [vmem:[%s5477_s1 + $0x1a] sm:$0xff]  ;;  %4103 = vmatprep.subr.bf16.mxu0 %v4622_v25  ;;  %vm4623_vm4 = vmmov 1   ;;  %s4624_s10 = smov 68   ;;  %vm313_vm6 = vcmask 244736  }
   0x7   :  { %3678 = vmatmul.mubr.msk.f32.gmra.mrb[2].mxu0 %vm78_vm2, %v67_v4  ;;  %3683 = vmatprep.mubr.msk.f32.mxu1 %vm4619_vm1, %v4618_v2  ;;  %v4732_v26 = vpack.c.bf16 %v18_v23, %v17_v22  ;;  %v20_v27 = vld [vmem:[%s5477_s1 + $0x22] sm:$0x3f]  ;;  %vm4743_vm5 = vmpackc.low %vm316_vm3, %vm4623_vm4  ;;  %s4625_s12 = smov 113   ;;  %vm1502_vm8 = vcmask 1046528   ;;  %vm1389_vm10 = vcmask 121856   ;;  %s4626_s19 = smov 83  }
   0x8   :  { %3691 = vmatprep.mubr.msk.f32.mxu0 %vm4619_vm1, %v4618_v2  ;;  %4131 = vmatprep.subr.bf16.mxu1 %v4622_v25  ;;  %v4739_v28 = vpack.c.bf16 %v20_v27, %v19_v24  ;;  %vm4994_vm9 = vmpackc.low %vm1502_vm8, %vm4623_vm4  ;;  %s4628_s26 = smov 98   ;;  %vm1419_vm11 = vcmask 1042432   ;;  %vm1392_vm13 = vcmask 367616   ;;  %vm1394_vm14 = vcmask 490496  }
   0x9   :  { %vm5142_vm12 = vmpackc.low %vm1419_vm11, %vm4623_vm4  ;;  %vm1415_vm15 = vcmask 613376   ;;  %vm3353_vm0 = vcmask 80896   ;;  %vm3358_vm3 = vcmask 203776  }
   0xa   :  { %3684 = vmatmul.mubr.msk.f32.gmra.mrb[2].mxu1 %vm78_vm2, %v69_v6 }
   0xb   :  { %3692 = vmatmul.mubr.msk.f32.vlgmr.msra.gmra.mrb[4].mxu0 %vm78_vm2, %v66_v1  ;;  %3686 = vmatprep.mubr.msk.f32.mxu1 %vm4619_vm1, %v4618_v2 }
   0xc   :  { %3694 = vmatprep.mubr.msk.f32.mxu0 %vm4619_vm1, %v4618_v2  ;;  %4105 = vmatpush3.bf16.msra.mxu0 %v4732_v26 }
   0xd   :  { %4106 = vmatprep.subr.bf16.mxu0 %v4622_v25 }
   0xe   :  { %3687 = vmatmul.mubr.msk.f32.gmra.mrb[4].mxu1 %vm78_vm2, %v70_v7 }
   0xf   :  { %3695 = vmatmul.mubr.msk.f32.gmra.mrb[6].mxu0 %vm78_vm2, %v67_v4  ;;  %3758 = vmatprep.mubr.msk.f32.mxu1 %vm4619_vm1, %v4618_v2 }
  0x10   :  { %3697 = vmatprep.mubr.msk.f32.mxu0 %vm4619_vm1, %v4618_v2  ;;  %4109 = vmatpush3.bf16.msk.msra.mxu0 %vm4743_vm5, %v4739_v28 }
  0x11   :  { %4110 = vmatprep.subr.bf16.mxu0 %v4622_v25 }
  0x13   :  { %3698 = vmatmul.mubr.msk.f32.gmra.mrb[8].mxu0 %vm78_vm2, %v68_v5 }
  0x14   :  { %3700 = vmatprep.mubr.msk.f32.mxu0 %vm4619_vm1, %v4618_v2 }
  0x17   :  { %3701 = vmatmul.mubr.msk.f32.gmra.mrb[2].mxu0 %vm78_vm2, %v69_v6 }
  0x18   :  { %3703 = vmatprep.mubr.msk.f32.mxu0 %vm4619_vm1, %v4618_v2 }
  0x1b   :  { %3704 = vmatmul.mubr.msk.f32.gmra.mrb[0].mxu0 %vm78_vm2, %v70_v7 }
  0x1c   :  { %3714 = vmatprep.mubr.msk.f32.mxu0 %vm4619_vm1, %v4618_v2 }
  0xd9   :  { %v174_v48 = vpop.f32.mrb[0].mxu1 }
  0xda   :  { %v3682_v49 = vpop.f32.mrb[1].mxu1  ;;  %v175_v53 = vadd.f32 %v4717_v8, %v174_v48  ;;  %v23_v48 = vld [vmem:[%s5477_s1 + $0x31] sm:$0xff] }
  0xdb   :  { %v24_v49 = vld [vmem:[%s5477_s1 + $0x39] sm:$0xff] }
  0xdd   :  { %v179_v5 = vpop.f32.mrb[2].mxu1 }
  0xde   :  { %v3685_v6 = vpop.f32.mrb[3].mxu1 }
  0xe1   :  { %v184_v27 = vpop.f32.mrb[4].mxu1 }
  0xee   :  { %v277_v9 = vpop.f32.mrb[0].mxu0 }
  0xef   :  { %v4346_v10 = vadd.f32 %v4717_v8, %v277_v9  ;;  %v3705_v11 = vpop.f32.mrb[1].mxu0 }
  0xf0   :  { %v180_v11 = vadd.f32 %v4717_v8, %v179_v5 }
  0xf1   :  { %4404 = vtanh.f32 %v4346_v10  ;;  %v3387_v13 = vmul.f32 -1.442695, %v4346_v10 }
  0xf3   :  { %4406 = vpow2.f32 %v3387_v13 }
  0xfb   :  { %v4405_v12 = vpop.eup %4404 }
  0xfc   :  { %295 = vrot.lane.b32.xlu0 %v4405_v12, %s4620_s27 }
  0xfd   :  { %v4407_v14 = vpop.eup %4406 }
  0xfe   :  { %v289_v15 = vadd.f32 1.0, %v4407_v14 }
 0x100   :  { %4408 = vrcp.f32 %v289_v15 }
 0x10a   :  { %v4409_v16 = vpop.eup %4408 }
 0x10b   :  { %v293_v19 = vmul.f32 0.0, %v4409_v16 }
 0x16e   :  { %v296_v17 = vpop.permute.xlu0 %295 }
 0x16f   :  { %v298_v18 = vmul.f32 %v4409_v16, %v296_v17 }
 0x171   :  { %300 = vrot.lane.b32.xlu0 %v298_v18, %s4621_s28 }
 0x1e3   :  { %v301_v20 = vpop.permute.xlu0 %300 }
 0x1e4   :  { %v303_v21 = vadd.f32 %v301_v20, %v293_v19 }
 0x1e6   :  { %4410 = vtanh.f32 %v303_v21 }
 0x1f0   :  { %v4411_v30 = vpop.eup %4410 }
 0x1f1   :  { %306 = vrot.lane.b32.xlu1 %v4411_v30, %s4621_s28 }
 0x263   :  { %v307_v31 = vpop.permute.xlu1 %306 }
 0x264   :  { %v309_v32 = vmul.f32 %v4409_v16, %v307_v31 }
 0x266   :  { %311 = vrot.lane.b32.xlu1 %v309_v32, %s4624_s10 }
 0x2d8   :  { %v4753_v33 = vpop.permute.xlu1 %311 }
 0x2d9   :  { %3715 = vmatmul.mubr.msk.f32.vlgmr.msra.gmra.mrb[2].mxu0 %vm313_vm6, %v4753_v33 }
 0x2da   :  { %4112 = vmatpush3.bf16.msra.mxu0 %v4732_v26  ;;  %3725 = vmatprep.mubr.msk.f32.mxu0 %vm4619_vm1, %v4618_v2 }
 0x2db   :  { %4113 = vmatprep.subr.bf16.mxu0 %v4622_v25 }
 0x2de   :  { %4116 = vmatpush3.bf16.msk.msra.mxu0 %vm4743_vm5, %v4739_v28 }
 0x2df   :  { %4117 = vmatprep.subr.bf16.mxu0 %v4622_v25 }
 0x3ac   :  { %v386_v34 = vpop.f32.mrb[2].mxu0 }
 0x3ad   :  { %v4347_v35 = vadd.f32 %v4717_v8, %v386_v34  ;;  %v3716_v36 = vpop.f32.mrb[3].mxu0  ;;  %v185_v34 = vadd.f32 %v4717_v8, %v184_v27 }
 0x3af   :  { %4412 = vtanh.f32 %v4347_v35  ;;  %v3390_v38 = vmul.f32 -1.442695, %v4347_v35 }
 0x3b1   :  { %4414 = vpow2.f32 %v3390_v38 }
 0x3b9   :  { %v4413_v37 = vpop.eup %4412 }
 0x3ba   :  { %399 = vrot.lane.b32.xlu0 %v4413_v37, %s4620_s27 }
 0x3bb   :  { %v4415_v39 = vpop.eup %4414 }
 0x3bc   :  { %v393_v40 = vadd.f32 1.0, %v4415_v39 }
 0x3be   :  { %4416 = vrcp.f32 %v393_v40 }
 0x3c8   :  { %v4417_v41 = vpop.eup %4416 }
 0x3c9   :  { %v397_v44 = vmul.f32 %v4417_v41, %v303_v21 }
 0x42c   :  { %v400_v42 = vpop.permute.xlu0 %399 }
 0x42d   :  { %v402_v43 = vmul.f32 %v4417_v41, %v400_v42 }
 0x42f   :  { %404 = vrot.lane.b32.xlu1 %v402_v43, %s4621_s28 }
 0x4a1   :  { %v405_v45 = vpop.permute.xlu1 %404 }
 0x4a2   :  { %v407_v46 = vadd.f32 %v405_v45, %v397_v44 }
 0x4a4   :  { %4418 = vtanh.f32 %v407_v46 }
 0x4ae   :  { %v4419_v47 = vpop.eup %4418 }
 0x4af   :  { %410 = vrot.lane.b32.xlu0 %v4419_v47, %s4621_s28  ;;  %v22_v47 = vld [vmem:[%s5477_s1 + $0x29] sm:$0xff] }
 0x521   :  { %v411_v50 = vpop.permute.xlu0 %410 }
 0x522   :  { %v413_v51 = vmul.f32 %v4417_v41, %v411_v50  ;;  %v4132_v50 = vpack.c.bf16 %v23_v48, %v22_v47 }
 0x524   :  { %415 = vrot.lane.b32.xlu1 %v413_v51, %s4624_s10  ;;  %v25_v51 = vld [vmem:[%s5477_s1 + $0x41] sm:$0x3f]  ;;  %4133 = vmatpush3.bf16.msra.mxu1 %v4132_v50 }
 0x525   :  { %4134 = vmatprep.subr.bf16.mxu1 %v4622_v25 }
 0x596   :  { %v4770_v52 = vpop.permute.xlu1 %415 }
 0x597   :  { %3726 = vmatmul.mubr.msk.f32.vlgmr.msra.gmra.mrb[8].mxu0 %vm313_vm6, %v4770_v52 }
 0x598   :  { %4119 = vmatpush3.bf16.msra.mxu0 %v4732_v26  ;;  %3736 = vmatprep.mubr.msk.f32.mxu0 %vm4619_vm1, %v4618_v2 }
 0x599   :  { %4120 = vmatprep.subr.bf16.mxu0 %v4622_v25 }
 0x59c   :  { %4123 = vmatpush3.bf16.msk.msra.mxu0 %vm4743_vm5, %v4739_v28 }
 0x59d   :  { %4124 = vmatprep.subr.bf16.mxu0 %v4622_v25 }
 0x66a   :  { %v485_v54 = vpop.f32.mrb[8].mxu0 }
 0x66b   :  { %v4349_v55 = vadd.f32 %v485_v54, %v175_v53  ;;  %v3727_v56 = vpop.f32.mrb[9].mxu0  ;;  %v4135_v53 = vpack.c.bf16 %v25_v51, %v24_v49 }
 0x66d   :  { %4420 = vtanh.f32 %v4349_v55  ;;  %v3393_v58 = vmul.f32 -1.442695, %v4349_v55  ;;  %4137 = vmatpush3.bf16.msk.msra.mxu1 %vm4743_vm5, %v4135_v53 }
 0x66e   :  { %4138 = vmatprep.subr.bf16.mxu1 %v4622_v25 }
 0x66f   :  { %4422 = vpow2.f32 %v3393_v58 }
 0x677   :  { %v4421_v57 = vpop.eup %4420 }
 0x678   :  { %498 = vrot.lane.b32.xlu0 %v4421_v57, %s4620_s27  ;;  %v71_v57 = vlaneseq }
 0x679   :  { %v4423_v59 = vpop.eup %4422 }
 0x67a   :  { %v492_v60 = vadd.f32 1.0, %v4423_v59  ;;  %v72_v58 = vand.u32 127, %v71_v57  ;;  %v26_v59 = vld [vmem:[%s5477_s1 + $0x47] sm:$0xff] }
 0x67c   :  { %4424 = vrcp.f32 %v492_v60  ;;  %v27_v60 = vld [vmem:[%s5477_s1 + $0x4f] sm:$0xff]  ;;  %vm73_vm7 = vcmp.lt.s32.totalorder %v72_v58, 15 }
 0x686   :  { %v4425_v61 = vpop.eup %4424 }
 0x687   :  { %v496_v0 = vmul.f32 %v4425_v61, %v407_v46 }
 0x6ea   :  { %v499_v62 = vpop.permute.xlu0 %498 }
 0x6eb   :  { %v501_v63 = vmul.f32 %v4425_v61, %v499_v62 }
 0x6ed   :  { %503 = vrot.lane.b32.xlu1 %v501_v63, %s4621_s28  ;;  %v28_v63 = vld [vmem:[%s5477_s1 + $0x57] sm:$0xff] }
 0x75f   :  { %v504_v1 = vpop.permute.xlu1 %503 }
 0x760   :  { %v506_v3 = vadd.f32 %v504_v1, %v496_v0  ;;  %v29_v0 = vld [vmem:[%s5477_s1 + $0x5f] sm:$0x3f] }
 0x762   :  { %4426 = vtanh.f32 %v506_v3 }
 0x76c   :  { %v4427_v4 = vpop.eup %4426 }
 0x76d   :  { %509 = vrot.lane.b32.xlu0 %v4427_v4, %s4621_s28 }
 0x7df   :  { %v510_v7 = vpop.permute.xlu0 %509 }
 0x7e0   :  { %v512_v9 = vmul.f32 %v4425_v61, %v510_v7  ;;  %v4139_v61 = vpack.c.bf16 %v27_v60, %v26_v59 }
 0x7e2   :  { %514 = vrot.lane.b32.xlu1 %v512_v9, %s4624_s10 }
 0x854   :  { %v4787_v10 = vpop.permute.xlu1 %514 }
 0x855   :  { %3737 = vmatmul.mubr.msk.f32.vlgmr.msra.gmra.mrb[6].mxu0 %vm313_vm6, %v4787_v10 }
 0x856   :  { %4126 = vmatpush3.bf16.msra.mxu0 %v4732_v26  ;;  %3747 = vmatprep.mubr.msk.f32.mxu0 %vm4619_vm1, %v4618_v2 }
 0x857   :  { %4127 = vmatprep.subr.bf16.mxu0 %v4622_v25 }
 0x85a   :  { %4130 = vmatpush3.bf16.msk.msra.mxu0 %vm4743_vm5, %v4739_v28  ;;  %v3688_v28 = vpop.f32.mrb[5].mxu1 }
 0x85b   :  { %4173 = vmatprep.subr.bf16.mxu0 %v4622_v25 }
 0x928   :  { %v584_v12 = vpop.f32.mrb[6].mxu0 }
 0x929   :  { %v4351_v13 = vadd.f32 %v584_v12, %v180_v11  ;;  %v3738_v14 = vpop.f32.mrb[7].mxu0 }
 0x92b   :  { %4428 = vtanh.f32 %v4351_v13  ;;  %v3396_v16 = vmul.f32 -1.442695, %v4351_v13 }
 0x92d   :  { %4430 = vpow2.f32 %v3396_v16 }
 0x935   :  { %v4429_v15 = vpop.eup %4428 }
 0x936   :  { %597 = vrot.lane.b32.xlu0 %v4429_v15, %s4620_s27 }
 0x937   :  { %v4431_v17 = vpop.eup %4430 }
 0x938   :  { %v591_v18 = vadd.f32 1.0, %v4431_v17 }
 0x93a   :  { %4432 = vrcp.f32 %v591_v18 }
 0x944   :  { %v4433_v19 = vpop.eup %4432 }
 0x945   :  { %v595_v22 = vmul.f32 %v4433_v19, %v506_v3  ;;  %v4142_v3 = vpack.c.bf16 %v29_v0, %v28_v63 }
 0x9a8   :  { %v598_v20 = vpop.permute.xlu0 %597 }
 0x9a9   :  { %v600_v21 = vmul.f32 %v4433_v19, %v598_v20  ;;  %v30_v20 = vld [vmem:[%s5477_s1 + $0x65] sm:$0xff] }
 0x9ab   :  { %602 = vrot.lane.b32.xlu1 %v600_v21, %s4621_s28  ;;  %v31_v21 = vld [vmem:[%s5477_s1 + $0x6d] sm:$0xff] }
 0xa1d   :  { %v603_v23 = vpop.permute.xlu1 %602 }
 0xa1e   :  { %v605_v24 = vadd.f32 %v603_v23, %v595_v22  ;;  %v32_v22 = vld [vmem:[%s5477_s1 + $0x75] sm:$0xff]  ;;  %v4907_v23 = vpack.c.bf16 %v31_v21, %v30_v20 }
 0xa20   :  { %4434 = vtanh.f32 %v605_v24 }
 0xa2a   :  { %v4435_v26 = vpop.eup %4434 }
 0xa2b   :  { %608 = vrot.lane.b32.xlu0 %v4435_v26, %s4621_s28 }
 0xa9d   :  { %v609_v30 = vpop.permute.xlu0 %608 }
 0xa9e   :  { %v611_v31 = vmul.f32 %v4433_v19, %v609_v30 }
 0xaa0   :  { %613 = vrot.lane.b32.xlu1 %v611_v31, %s4624_s10 }
 0xb12   :  { %v614_v32 = vpop.permute.xlu1 %613 }
 0xb13   :  { %3748 = vmatmul.mubr.msk.f32.vlgmr.msra.gmra.mrb[4].mxu0 %vm313_vm6, %v614_v32  ;;  %v719_v4 = vsel %vm73_vm7, %v4770_v52, %v614_v32  ;;  %v720_v5 = vsel %vm73_vm7, %v614_v32, %v4770_v52 }
 0xb14   :  { %3860 = vmatprep.mubr.msk.f32.mxu0 %vm4619_vm1, %v4618_v2 }
 0xbe6   :  { %v683_v35 = vpop.f32.mrb[4].mxu0 }
 0xbe7   :  { %v4353_v36 = vadd.f32 %v683_v35, %v185_v34  ;;  %v3749_v37 = vpop.f32.mrb[5].mxu0 }
 0xbe9   :  { %4436 = vtanh.f32 %v4353_v36  ;;  %v3399_v39 = vmul.f32 -1.442695, %v4353_v36 }
 0xbeb   :  { %4438 = vpow2.f32 %v3399_v39 }
 0xbf3   :  { %v4437_v38 = vpop.eup %4436 }
 0xbf4   :  { %696 = vrot.lane.b32.xlu0 %v4437_v38, %s4620_s27 }
 0xbf5   :  { %v4439_v40 = vpop.eup %4438 }
 0xbf6   :  { %v690_v41 = vadd.f32 1.0, %v4439_v40 }
 0xbf8   :  { %4440 = vrcp.f32 %v690_v41 }
 0xc02   :  { %v4441_v42 = vpop.eup %4440 }
 0xc03   :  { %v694_v45 = vmul.f32 %v4441_v42, %v605_v24  ;;  %v33_v24 = vld [vmem:[%s5477_s1 + $0x7d] sm:$0x3f] }
 0xc04   :  { %v4913_v26 = vpack.c.bf16 %v33_v24, %v32_v22  ;;  %v35_v24 = vld [vmem:[%s5477_s1 + $0x84] sm:$0xff] }
 0xc66   :  { %v697_v43 = vpop.permute.xlu0 %696 }
 0xc67   :  { %v699_v44 = vmul.f32 %v4441_v42, %v697_v43 }
 0xc69   :  { %701 = vrot.lane.b32.xlu1 %v699_v44, %s4621_s28 }
 0xcdb   :  { %v702_v46 = vpop.permute.xlu1 %701 }
 0xcdc   :  { %v4810_v8 = vadd.f32 %v702_v46, %v694_v45 }
 0xcde   :  { %4442 = vtanh.f32 %v4810_v8 }
 0xce8   :  { %v4443_v54 = vpop.eup %4442 }
 0xce9   :  { %707 = vrot.lane.b32.xlu0 %v4443_v54, %s4621_s28 }
 0xd5b   :  { %v708_v55 = vpop.permute.xlu0 %707 }
 0xd5c   :  { %v4830_v56 = vmul.f32 %v4441_v42, %v708_v55 }
 0xd5e   :  { %713 = vrot.lane.b32.xlu1 %v4830_v56, %s4624_s10 }
 0xdd0   :  { %v714_v62 = vpop.permute.xlu1 %713 }
 0xdd1   :  { %v716_v1 = vsel %vm73_vm7, %v4753_v33, %v714_v62  ;;  %v721_v6 = vsel %vm73_vm7, %v714_v62, %v4753_v33  ;;  %v4893_v33 = vld [vmem:[%s5477_s1 + $0x83] ss:$0 sm:$0xff] }
 0xdd2   :  { %3759 = vmatmul.mubr.msk.f32.vlgmr.msra.gmra.mrb[6].mxu1 %vm313_vm6, %v716_v1 }
 0xdd3   :  { %4140 = vmatpush3.bf16.msra.mxu1 %v4139_v61  ;;  %3761 = vmatprep.mubr.msk.f32.mxu1 %vm4619_vm1, %v4618_v2 }
 0xdd4   :  { %4141 = vmatprep.subr.bf16.mxu1 %v4622_v25 }
 0xdd6   :  { %3762 = vmatmul.mubr.msk.f32.gmra.mrb[8].mxu1 %vm313_vm6, %v719_v4 }
 0xdd7   :  { %3764 = vmatprep.mubr.msk.f32.mxu1 %vm4619_vm1, %v4618_v2  ;;  %4144 = vmatpush3.bf16.msk.msra.mxu1 %vm4743_vm5, %v4142_v3 }
 0xdd8   :  { %4145 = vmatprep.subr.bf16.mxu1 %v4622_v25 }
 0xdda   :  { %3765 = vmatmul.mubr.msk.f32.gmra.mrb[10].mxu1 %vm313_vm6, %v4787_v10 }
 0xddb   :  { %3767 = vmatprep.mubr.msk.f32.mxu1 %vm4619_vm1, %v4618_v2 }
 0xdde   :  { %3768 = vmatmul.mubr.msk.f32.gmra.mrb[12].mxu1 %vm313_vm6, %v720_v5 }
 0xddf   :  { %3770 = vmatprep.mubr.msk.f32.mxu1 %vm4619_vm1, %v4618_v2 }
 0xde2   :  { %3771 = vmatmul.mubr.msk.f32.gmra.mrb[14].mxu1 %vm313_vm6, %v721_v6 }
 0xde3   :  { %3781 = vmatprep.mubr.msk.f32.mxu1 %vm4619_vm1, %v4618_v2 }
 0xdea   :  { %3782 = vmatmul.mubr.msk.f32.vlgmr.msra.gmra.mrb[14].mxu1 %vm313_vm6, %v716_v1 }
 0xdeb   :  { %3784 = vmatprep.mubr.msk.f32.mxu1 %vm4619_vm1, %v4618_v2  ;;  %4147 = vmatpush3.bf16.msra.mxu1 %v4907_v23 }
 0xdec   :  { %4148 = vmatprep.subr.bf16.mxu1 %v4622_v25 }
 0xdee   :  { %3785 = vmatmul.mubr.msk.f32.gmra.mrb[12].mxu1 %vm313_vm6, %v719_v4 }
 0xdef   :  { %3787 = vmatprep.mubr.msk.f32.mxu1 %vm4619_vm1, %v4618_v2  ;;  %4151 = vmatpush3.bf16.msk.msra.mxu1 %vm4743_vm5, %v4913_v26 }
 0xdf0   :  { %4152 = vmatprep.subr.bf16.mxu1 %v4622_v25 }
 0xdf2   :  { %3788 = vmatmul.mubr.msk.f32.gmra.mrb[10].mxu1 %vm313_vm6, %v4787_v10 }
 0xdf3   :  { %3790 = vmatprep.mubr.msk.f32.mxu1 %vm4619_vm1, %v4618_v2 }
 0xdf6   :  { %3791 = vmatmul.mubr.msk.f32.gmra.mrb[8].mxu1 %vm313_vm6, %v720_v5 }
 0xdf7   :  { %3793 = vmatprep.mubr.msk.f32.mxu1 %vm4619_vm1, %v4618_v2 }
 0xdfa   :  { %3794 = vmatmul.mubr.msk.f32.gmra.mrb[6].mxu1 %vm313_vm6, %v721_v6 }
 0xdfb   :  { %3804 = vmatprep.mubr.msk.f32.mxu1 %vm4619_vm1, %v4618_v2 }
 0xecd   :  { %v920_v52 = vpop.f32.mrb[6].mxu1 }
 0xece   :  { %v4354_v7 = vadd.f32 %v4893_v33, %v920_v52  ;;  %v3795_v9 = vpop.f32.mrb[7].mxu1 }
 0xed0   :  { %4444 = vtanh.f32 %v4354_v7  ;;  %v3413_v11 = vmul.f32 -1.442695, %v4354_v7 }
 0xed2   :  { %4446 = vpow2.f32 %v3413_v11 }
 0xeda   :  { %v4445_v10 = vpop.eup %4444 }
 0xedb   :  { %938 = vrot.lane.b32.xlu0 %v4445_v10, %s4620_s27 }
 0xedc   :  { %v4447_v12 = vpop.eup %4446 }
 0xedd   :  { %v932_v13 = vadd.f32 1.0, %v4447_v12 }
 0xedf   :  { %4448 = vrcp.f32 %v932_v13 }
 0xee9   :  { %v4449_v14 = vpop.eup %4448 }
 0xeea   :  { %v936_v17 = vmul.f32 0.0, %v4449_v14 }
 0xf4d   :  { %v939_v15 = vpop.permute.xlu0 %938 }
 0xf4e   :  { %v941_v16 = vmul.f32 %v4449_v14, %v939_v15 }
 0xf50   :  { %943 = vrot.lane.b32.xlu1 %v941_v16, %s4621_s28 }
 0xfc2   :  { %v944_v18 = vpop.permute.xlu1 %943 }
 0xfc3   :  { %v946_v19 = vadd.f32 %v944_v18, %v936_v17 }
 0xfc5   :  { %4450 = vtanh.f32 %v946_v19 }
 0xfcf   :  { %v4451_v27 = vpop.eup %4450 }
 0xfd0   :  { %949 = vrot.lane.b32.xlu0 %v4451_v27, %s4621_s28 }
0x1042   :  { %v950_v28 = vpop.permute.xlu0 %949 }
0x1043   :  { %v4921_v30 = vmul.f32 %v4449_v14, %v950_v28 }
0x1045   :  { %954 = vrot.lane.b32.xlu1 %v4921_v30, %s4624_s10 }
0x10b7   :  { %v955_v31 = vpop.permute.xlu1 %954 }
0x10b8   :  { %3805 = vmatmul.mubr.msk.f32.vlgmr.msra.gmra.mrb[8].mxu1 %vm313_vm6, %v955_v31 }
0x10b9   :  { %4154 = vmatpush3.bf16.msra.mxu1 %v4907_v23  ;;  %3815 = vmatprep.mubr.msk.f32.mxu1 %vm4619_vm1, %v4618_v2 }
0x10ba   :  { %4155 = vmatprep.subr.bf16.mxu1 %v4622_v25 }
0x10bd   :  { %4158 = vmatpush3.bf16.msk.msra.mxu1 %vm4743_vm5, %v4913_v26 }
0x10be   :  { %4159 = vmatprep.subr.bf16.mxu1 %v4622_v25 }
0x118b   :  { %v1027_v32 = vpop.f32.mrb[8].mxu1 }
0x118c   :  { %v4355_v34 = vadd.f32 %v4893_v33, %v1027_v32  ;;  %v3806_v35 = vpop.f32.mrb[9].mxu1 }
0x118e   :  { %4452 = vtanh.f32 %v4355_v34  ;;  %v3416_v37 = vmul.f32 -1.442695, %v4355_v34 }
0x1190   :  { %4454 = vpow2.f32 %v3416_v37 }
0x1198   :  { %v4453_v36 = vpop.eup %4452 }
0x1199   :  { %1040 = vrot.lane.b32.xlu0 %v4453_v36, %s4620_s27  ;;  %v5012_v36 = vld [vmem:[%s5477_s1 + $0xb2] ss:$0 sm:$0xff] }
0x119a   :  { %v4455_v38 = vpop.eup %4454 }
0x119b   :  { %v1034_v39 = vadd.f32 1.0, %v4455_v38 }
0x119d   :  { %4456 = vrcp.f32 %v1034_v39 }
0x11a7   :  { %v4457_v40 = vpop.eup %4456 }
0x11a8   :  { %v1038_v43 = vmul.f32 %v4457_v40, %v946_v19 }
0x120b   :  { %v1041_v41 = vpop.permute.xlu0 %1040 }
0x120c   :  { %v1043_v42 = vmul.f32 %v4457_v40, %v1041_v41 }
0x120e   :  { %1045 = vrot.lane.b32.xlu1 %v1043_v42, %s4621_s28 }
0x1280   :  { %v1046_v44 = vpop.permute.xlu1 %1045 }
0x1281   :  { %v1048_v45 = vadd.f32 %v1046_v44, %v1038_v43 }
0x1283   :  { %4458 = vtanh.f32 %v1048_v45 }
0x128d   :  { %v4459_v46 = vpop.eup %4458 }
0x128e   :  { %1051 = vrot.lane.b32.xlu0 %v4459_v46, %s4621_s28 }
0x1300   :  { %v1052_v47 = vpop.permute.xlu0 %1051 }
0x1301   :  { %v4938_v48 = vmul.f32 %v4457_v40, %v1052_v47 }
0x1303   :  { %1056 = vrot.lane.b32.xlu1 %v4938_v48, %s4624_s10 }
0x1375   :  { %v1057_v49 = vpop.permute.xlu1 %1056 }
0x1376   :  { %3816 = vmatmul.mubr.msk.f32.vlgmr.msra.gmra.mrb[10].mxu1 %vm313_vm6, %v1057_v49 }
0x1377   :  { %4161 = vmatpush3.bf16.msra.mxu1 %v4907_v23  ;;  %3826 = vmatprep.mubr.msk.f32.mxu1 %vm4619_vm1, %v4618_v2 }
0x1378   :  { %4162 = vmatprep.subr.bf16.mxu1 %v4622_v25 }
0x137b   :  { %4165 = vmatpush3.bf16.msk.msra.mxu1 %vm4743_vm5, %v4913_v26 }
0x137c   :  { %4166 = vmatprep.subr.bf16.mxu1 %v4622_v25 }
0x1449   :  { %v1126_v50 = vpop.f32.mrb[10].mxu1 }
0x144a   :  { %v4356_v51 = vadd.f32 %v4893_v33, %v1126_v50  ;;  %v3817_v53 = vpop.f32.mrb[11].mxu1 }
0x144c   :  { %4460 = vtanh.f32 %v4356_v51  ;;  %v3419_v55 = vmul.f32 -1.442695, %v4356_v51 }
0x144e   :  { %4462 = vpow2.f32 %v3419_v55 }
0x1456   :  { %v4461_v54 = vpop.eup %4460 }
0x1457   :  { %1139 = vrot.lane.b32.xlu0 %v4461_v54, %s4620_s27 }
0x1458   :  { %v4463_v57 = vpop.eup %4462 }
0x1459   :  { %v1133_v58 = vadd.f32 1.0, %v4463_v57 }
0x145b   :  { %4464 = vrcp.f32 %v1133_v58 }
0x1465   :  { %v4465_v59 = vpop.eup %4464 }
0x1466   :  { %v1137_v62 = vmul.f32 %v4465_v59, %v1048_v45 }
0x14c9   :  { %v1140_v60 = vpop.permute.xlu0 %1139 }
0x14ca   :  { %v1142_v61 = vmul.f32 %v4465_v59, %v1140_v60 }
0x14cc   :  { %1144 = vrot.lane.b32.xlu1 %v1142_v61, %s4621_s28 }
0x153e   :  { %v1145_v63 = vpop.permute.xlu1 %1144 }
0x153f   :  { %v1147_v0 = vadd.f32 %v1145_v63, %v1137_v62 }
0x1541   :  { %4466 = vtanh.f32 %v1147_v0 }
0x154b   :  { %v4467_v1 = vpop.eup %4466 }
0x154c   :  { %1150 = vrot.lane.b32.xlu0 %v4467_v1, %s4621_s28 }
0x15be   :  { %v1151_v3 = vpop.permute.xlu0 %1150 }
0x15bf   :  { %v4955_v4 = vmul.f32 %v4465_v59, %v1151_v3 }
0x15c1   :  { %1155 = vrot.lane.b32.xlu1 %v4955_v4, %s4624_s10 }
0x1633   :  { %v1156_v5 = vpop.permute.xlu1 %1155 }
0x1634   :  { %3827 = vmatmul.mubr.msk.f32.vlgmr.msra.gmra.mrb[12].mxu1 %vm313_vm6, %v1156_v5 }
0x1635   :  { %4168 = vmatpush3.bf16.msra.mxu1 %v4907_v23  ;;  %3837 = vmatprep.mubr.msk.f32.mxu1 %vm4619_vm1, %v4618_v2 }
0x1636   :  { %4169 = vmatprep.subr.bf16.mxu1 %v4622_v25 }
0x1639   :  { %4172 = vmatpush3.bf16.msk.msra.mxu1 %vm4743_vm5, %v4913_v26  ;;  %v36_v26 = vld [vmem:[%s5477_s1 + $0x8c] sm:$0x7f] }
0x163a   :  { %4189 = vmatprep.subr.bf16.mxu1 %v4622_v25  ;;  %v4991_v27 = vpack.c.bf16 %v36_v26, %v35_v24 }
0x1707   :  { %v1225_v6 = vpop.f32.mrb[12].mxu1 }
0x1708   :  { %v4357_v52 = vadd.f32 %v4893_v33, %v1225_v6  ;;  %v3828_v7 = vpop.f32.mrb[13].mxu1  ;;  %v37_v6 = vld [vmem:[%s5477_s1 + $0x93] sm:$0xff] }
0x1709   :  { %v39_v7 = vld [vmem:[%s5477_s1 + $0xa3] sm:$0xff] }
0x170a   :  { %4468 = vtanh.f32 %v4357_v52  ;;  %v3422_v10 = vmul.f32 -1.442695, %v4357_v52  ;;  %v38_v52 = vld [vmem:[%s5477_s1 + $0x9b] sm:$0xff] }
0x170c   :  { %4470 = vpow2.f32 %v3422_v10  ;;  %v40_v10 = vld [vmem:[%s5477_s1 + $0xab] sm:$0x3f] }
0x1714   :  { %v4469_v9 = vpop.eup %4468 }
0x1715   :  { %1238 = vrot.lane.b32.xlu0 %v4469_v9, %s4620_s27  ;;  %v5040_v9 = vpack.c.bf16 %v38_v52, %v37_v6  ;;  %v51_v6 = vld [vmem:[%s5478_s2 + $0x40] sm:$0xff]  ;;  %v52_v52 = vld [vmem:[%s5478_s2 + $0x48] sm:$0x7] }
0x1716   :  { %v4471_v11 = vpop.eup %4470 }
0x1717   :  { %v1232_v12 = vadd.f32 1.0, %v4471_v11  ;;  %v5046_v11 = vpack.c.bf16 %v40_v10, %v39_v7 }
0x1719   :  { %4472 = vrcp.f32 %v1232_v12 }
0x1723   :  { %v4473_v13 = vpop.eup %4472 }
0x1724   :  { %v1236_v16 = vmul.f32 %v4473_v13, %v1147_v0 }
0x1787   :  { %v1239_v14 = vpop.permute.xlu0 %1238 }
0x1788   :  { %v1241_v15 = vmul.f32 %v4473_v13, %v1239_v14 }
0x178a   :  { %1243 = vrot.lane.b32.xlu1 %v1241_v15, %s4621_s28 }
0x17fc   :  { %v1244_v17 = vpop.permute.xlu1 %1243 }
0x17fd   :  { %v4971_v18 = vadd.f32 %v1244_v17, %v1236_v16 }
0x17ff   :  { %4474 = vtanh.f32 %v4971_v18 }
0x1809   :  { %v4475_v19 = vpop.eup %4474 }
0x180a   :  { %1249 = vrot.lane.b32.xlu0 %v4475_v19, %s4621_s28 }
0x180e   :  { %1396 = vrot.lane.b32.xlu0 %v4830_v56, %s4625_s12 }
0x187c   :  { %v1250_v20 = vpop.permute.xlu0 %1249 }
0x187d   :  { %v4977_v21 = vmul.f32 %v4473_v13, %v1250_v20 }
0x187f   :  { %1254 = vrot.lane.b32.xlu1 %v4977_v21, %s4624_s10 }
0x1880   :  { %v1397_v22 = vpop.permute.xlu0 %1396 }
0x1881   :  { %v1399_v23 = vadd.f32 %v1397_v22, %v4830_v56  ;;  %v5068_v22 = vld [vmem:[%s5477_s1 + $0xb1] ss:$0 sm:$0xff] }
0x1883   :  { %1498 = vrot.lane.b32.xlu1 %v1399_v23, %s4624_s10 }
0x1887   :  { %1401 = vrot.lane.b32.xlu1 %v4810_v8, %s4625_s12 }
0x18f1   :  { %v1255_v56 = vpop.permute.xlu1 %1254 }
0x18f2   :  { %3838 = vmatmul.mubr.msk.f32.vlgmr.msra.gmra.mrb[14].mxu1 %vm313_vm6, %v1255_v56 }
0x18f3   :  { %4192 = vmatpush3.bf16.msk.msra.mxu1 %vm4994_vm9, %v4991_v27  ;;  %3867 = vmatprep.mubr.msk.f32.mxu1 %vm4619_vm1, %v4618_v2 }
0x18f4   :  { %4193 = vmatprep.subr.bf16.mxu1 %v4622_v25 }
0x18f5   :  { %v1499_v31 = vpop.permute.xlu1 %1498 }
0x18f6   :  { %3868 = vmatmul.mubr.msk.f32.vlgmr.msra.gmra.mrb[16].mxu1 %vm1389_vm10, %v1499_v31 }
0x18f7   :  { %3878 = vmatprep.mubr.msk.f32.mxu1 %vm4619_vm1, %v4618_v2  ;;  %4195 = vmatpush3.bf16.msra.mxu1 %v5040_v9 }
0x18f8   :  { %4196 = vmatprep.subr.bf16.mxu1 %v4622_v25 }
0x18f9   :  { %v1402_v49 = vpop.permute.xlu1 %1401 }
0x18fa   :  { %v1404_v55 = vadd.f32 %v1402_v49, %v4810_v8 }
0x18fb   :  { %4199 = vmatpush3.bf16.msk.msra.mxu1 %vm4743_vm5, %v5046_v11 }
0x18fc   :  { %4200 = vmatprep.subr.bf16.mxu1 %v4622_v25 }
0x19c5   :  { %v1324_v32 = vpop.f32.mrb[14].mxu1 }
0x19c6   :  { %v4358_v34 = vadd.f32 %v4893_v33, %v1324_v32  ;;  %v3839_v35 = vpop.f32.mrb[15].mxu1 }
0x19c8   :  { %4476 = vtanh.f32 %v4358_v34  ;;  %v3425_v33 = vmul.f32 -1.442695, %v4358_v34 }
0x19c9   :  { %v1572_v37 = vpop.f32.mrb[16].mxu1 }
0x19ca   :  { %v1573_v38 = vadd.f32 %v5012_v36, %v1572_v37  ;;  %v3869_v39 = vpop.f32.mrb[17].mxu1 }
0x19cc   :  { %4478 = vtanh.f32 %v1573_v38  ;;  %v3432_v42 = vmul.f32 -1.442695, %v1573_v38 }
0x19cd   :  { %4480 = vpow2.f32 %v3425_v33 }
0x19ce   :  { %4482 = vpow2.f32 %v3432_v42 }
0x19d2   :  { %v4477_v40 = vpop.eup %4476 }
0x19d3   :  { %1337 = vrot.lane.b32.xlu0 %v4477_v40, %s4620_s27  ;;  %s4627_s27 = smov 15  }
0x19d6   :  { %v4479_v41 = vpop.eup %4478 }
0x19d7   :  { %1589 = vrot.lane.b32.xlu1 %v4479_v41, %s4626_s19  ;;  %v4481_v43 = vpop.eup %4480 }
0x19d8   :  { %v1331_v44 = vadd.f32 1.0, %v4481_v43  ;;  %v4483_v45 = vpop.eup %4482  ;;  %v53_v43 = vld [vmem:[%s5478_s2 + $0x4b] sm:$0xff] }
0x19d9   :  { %v1579_v46 = vadd.f32 1.0, %v4483_v45 }
0x19da   :  { %4484 = vrcp.f32 %v1331_v44  ;;  %v54_v44 = vld [vmem:[%s5478_s2 + $0x53] sm:$0x7f] }
0x19db   :  { %4486 = vrcp.f32 %v1579_v46  ;;  %v5085_v45 = vpack.c.bf16 %v54_v44, %v53_v43 }
0x19e4   :  { %v4485_v47 = vpop.eup %4484 }
0x19e5   :  { %v4487_v53 = vpop.eup %4486  ;;  %v1335_v58 = vmul.f32 %v4485_v47, %v4971_v18 }
0x1a45   :  { %v1338_v50 = vpop.permute.xlu0 %1337 }
0x1a46   :  { %v1340_v51 = vmul.f32 %v4485_v47, %v1338_v50 }
0x1a48   :  { %1342 = vrot.lane.b32.xlu0 %v1340_v51, %s4621_s28  ;;  %v43_v51 = vld [vmem:[%s5478_s2] sm:$0xff] }
0x1a49   :  { %v1590_v54 = vpop.permute.xlu1 %1589 }
0x1a4a   :  { %v1592_v57 = vmul.f32 %v4487_v53, %v1590_v54  ;;  %v45_v54 = vld [vmem:[%s5478_s2 + $0x10] sm:$0xff] }
0x1a4c   :  { %1584 = vrot.lane.b32.xlu0 %v1404_v55, %s4625_s12  ;;  %1594 = vrot.lane.b32.xlu1 %v1592_v57, %s4627_s27  ;;  %v46_v57 = vld [vmem:[%s5478_s2 + $0x18] sm:$0xff] }
0x1aba   :  { %v1343_v59 = vpop.permute.xlu0 %1342 }
0x1abb   :  { %v1345_v60 = vadd.f32 %v1343_v59, %v1335_v58  ;;  %v47_v59 = vld [vmem:[%s5478_s2 + $0x20] sm:$0xff] }
0x1abd   :  { %4488 = vtanh.f32 %v1345_v60 }
0x1abe   :  { %v1585_v61 = vpop.permute.xlu0 %1584  ;;  %v1595_v63 = vpop.permute.xlu1 %1594 }
0x1abf   :  { %v1587_v62 = vmul.f32 %v4487_v53, %v1585_v61 }
0x1ac1   :  { %v5022_v0 = vadd.f32 %v1595_v63, %v1587_v62  ;;  %v49_v62 = vld [vmem:[%s5478_s2 + $0x30] sm:$0xff]  ;;  %v50_v63 = vld [vmem:[%s5478_s2 + $0x38] sm:$0xff] }
0x1ac3   :  { %4490 = vtanh.f32 %v5022_v0 }
0x1ac7   :  { %v4489_v1 = vpop.eup %4488 }
0x1ac8   :  { %1348 = vrot.lane.b32.xlu0 %v4489_v1, %s4621_s28 }
0x1acd   :  { %v4491_v8 = vpop.eup %4490 }
0x1ace   :  { %1600 = vrot.lane.b32.xlu0 %v4491_v8, %s4627_s27  ;;  %v4183_v8 = vpack.c.bf16 %v50_v63, %v49_v62 }
0x1b3a   :  { %v1349_v3 = vpop.permute.xlu0 %1348 }
0x1b3b   :  { %v5027_v5 = vmul.f32 %v4485_v47, %v1349_v3 }
0x1b3d   :  { %1353 = vrot.lane.b32.xlu1 %v5027_v5, %s4625_s12 }
0x1b40   :  { %v1601_v12 = vpop.permute.xlu0 %1600 }
0x1b41   :  { %v1603_v13 = vmul.f32 %v4487_v53, %v1601_v12  ;;  %v44_v53 = vld [vmem:[%s5478_s2 + $0x8] sm:$0xff] }
0x1b42   :  { %v4174_v55 = vpack.c.bf16 %v44_v53, %v43_v51 }
0x1b43   :  { %1605 = vrot.lane.b32.xlu1 %v1603_v13, %s4628_s26 }
0x1b44   :  { %4175 = vmatpush3.bf16.msra.mxu0 %v4174_v55 }
0x1b45   :  { %4176 = vmatprep.subr.bf16.mxu0 %v4622_v25 }
0x1b47   :  { %1407 = vrot.lane.b32.xlu1 %v1345_v60, %s4625_s12 }
0x1baf   :  { %v1354_v14 = vpop.permute.xlu1 %1353 }
0x1bb0   :  { %v1405_v15 = vadd.f32 %v1354_v14, %v5027_v5  ;;  %v1356_v58 = vadd.f32 %v1354_v14, %v4921_v30 }
0x1bb2   :  { %1609 = vrot.lane.b32.xlu0 %v1405_v15, %s4626_s19  ;;  %v56_v15 = vld [vmem:[%s5478_s2 + $0x5b] sm:$0xff] }
0x1bb5   :  { %v5057_v16 = vpop.permute.xlu1 %1605 }
0x1bb9   :  { %v1408_v17 = vpop.permute.xlu1 %1407 }
0x1bba   :  { %v1410_v18 = vadd.f32 %v1408_v17, %v1345_v60  ;;  %v48_v60 = vld [vmem:[%s5478_s2 + $0x28] sm:$0xff] }
0x1bbb   :  { %v4180_v61 = vpack.c.bf16 %v48_v60, %v47_v59 }
0x1bbc   :  { %1701 = vrot.lane.b32.xlu1 %v1410_v18, %s4625_s12 }
0x1c24   :  { %v1610_v19 = vpop.permute.xlu0 %1609 }
0x1c25   :  { %v1612_v20 = vsel %vm1389_vm10, %v5057_v16, %v1610_v19 }
0x1c26   :  { %3879 = vmatmul.mubr.msk.f32.vlgmr.msra.gmra.mrb[18].mxu1 %vm313_vm6, %v1612_v20 }
0x1c27   :  { %3885 = vmatprep.mubr.msk.f32.mxu1 %vm4619_vm1, %v4618_v2  ;;  %4203 = vmatpush3.bf16.msk.msra.mxu1 %vm4994_vm9, %v5085_v45 }
0x1c28   :  { %4220 = vmatprep.subr.bf16.mxu1 %v4622_v25 }
0x1c2e   :  { %v1702_v39 = vpop.permute.xlu1 %1701 }
0x1cf9   :  { %v1689_v23 = vpop.f32.mrb[18].mxu1 }
0x1cfa   :  { %v1690_v24 = vadd.f32 %v5068_v22, %v1689_v23  ;;  %v3880_v26 = vpop.f32.mrb[19].mxu1 }
0x1cfc   :  { %4492 = vtanh.f32 %v1690_v24  ;;  %v3436_v31 = vmul.f32 -1.442695, %v1690_v24 }
0x1cfe   :  { %4494 = vpow2.f32 %v3436_v31  ;;  %v59_v31 = vld [vmem:[%s5478_s2 + $0x73] sm:$0xff] }
0x1d06   :  { %v4493_v56 = vpop.eup %4492 }
0x1d07   :  { %1706 = vrot.lane.b32.xlu0 %v4493_v56, %s4626_s19 }
0x1d08   :  { %v4495_v32 = vpop.eup %4494 }
0x1d09   :  { %v1696_v34 = vadd.f32 1.0, %v4495_v32 }
0x1d0b   :  { %4496 = vrcp.f32 %v1696_v34  ;;  %v60_v34 = vld [vmem:[%s5478_s2 + $0x7b] sm:$0xff] }
0x1d15   :  { %v4497_v35 = vpop.eup %4496 }
0x1d16   :  { %v1704_v40 = vmul.f32 %v4497_v35, %v1702_v39 }
0x1d79   :  { %v1707_v37 = vpop.permute.xlu0 %1706 }
0x1d7a   :  { %v1709_v38 = vmul.f32 %v4497_v35, %v1707_v37 }
0x1d7c   :  { %1711 = vrot.lane.b32.xlu0 %v1709_v38, %s4627_s27 }
0x1dee   :  { %v1712_v41 = vpop.permute.xlu0 %1711 }
0x1def   :  { %v5073_v33 = vadd.f32 %v1712_v41, %v1704_v40  ;;  %v62_v40 = vld [vmem:[%s5478_s2 + $0x8b] sm:$0xff]  ;;  %v63_v41 = vld [vmem:[%s5478_s2 + $0x93] sm:$0xff] }
0x1df1   :  { %4498 = vtanh.f32 %v5073_v33 }
0x1dfb   :  { %v4499_v42 = vpop.eup %4498 }
0x1dfc   :  { %1717 = vrot.lane.b32.xlu1 %v4499_v42, %s4627_s27  ;;  %v5210_v42 = vpack.c.bf16 %v63_v41, %v62_v40 }
0x1e00   :  { %1357 = vrot.lane.b32.xlu1 %v4977_v21, %s4625_s12 }
0x1e04   :  { %1365 = vrot.lane.b32.xlu1 %v4938_v48, %s4625_s12 }
0x1e6e   :  { %v1718_v46 = vpop.permute.xlu1 %1717 }
0x1e6f   :  { %v5093_v47 = vmul.f32 %v4497_v35, %v1718_v46  ;;  %v61_v35 = vld [vmem:[%s5478_s2 + $0x83] sm:$0xff] }
0x1e70   :  { %v5200_v37 = vpack.c.bf16 %v61_v35, %v60_v34 }
0x1e71   :  { %1722 = vrot.lane.b32.xlu0 %v5093_v47, %s4628_s26 }
0x1e72   :  { %v1358_v49 = vpop.permute.xlu1 %1357 }
0x1e73   :  { %v1360_v50 = vadd.f32 %v1358_v49, %v4938_v48  ;;  %v4177_v48 = vpack.c.bf16 %v46_v57, %v45_v54  ;;  %v64_v49 = vld [vmem:[%s5478_s2 + $0x9b] sm:$0xff] }
0x1e75   :  { %1361 = vrot.lane.b32.xlu0 %v4955_v4, %s4625_s12  ;;  %1378 = vrot.lane.b32.xlu1 %v1360_v50, %s4626_s19  ;;  %v65_v50 = vld [vmem:[%s5478_s2 + $0xa3] sm:$0x7] }
0x1e76   :  { %4178 = vmatpush3.bf16.msra.mxu0 %v4177_v48  ;;  %v1366_v1 = vpop.permute.xlu1 %1365  ;;  %v5221_v51 = vpack.c.bf16 %v65_v50, %v64_v49  ;;  %v3426_v48 = vld [vmem:[%s5478_s2 + $0x5a] ss:$0 sm:$0xff] }
0x1e77   :  { %4179 = vmatprep.subr.bf16.mxu0 %v4622_v25  ;;  %v1368_v3 = vadd.f32 %v1366_v1, %v4977_v21 }
0x1e79   :  { %1374 = vrot.lane.b32.xlu0 %v1356_v58, %s4624_s10 }
0x1e7a   :  { %4181 = vmatpush3.bf16.msra.mxu0 %v4180_v61 }
0x1e7b   :  { %4182 = vmatprep.subr.bf16.mxu0 %v4622_v25 }
0x1e7d   :  { %1369 = vrot.lane.b32.xlu0 %v4921_v30, %s4625_s12  ;;  %v4186_v30 = vpack.c.bf16 %v52_v52, %v51_v6 }
0x1e7e   :  { %4184 = vmatpush3.bf16.msra.mxu0 %v4183_v8 }
0x1e7f   :  { %4185 = vmatprep.subr.bf16.mxu0 %v4622_v25 }
0x1e81   :  { %1386 = vrot.lane.b32.xlu0 %v1368_v3, %s4625_s12 }
0x1e82   :  { %4188 = vmatpush3.bf16.msk.msra.mxu0 %vm5142_vm12, %v4186_v30 }
0x1e83   :  { %4204 = vmatprep.subr.bf16.mxu0 %v4622_v25 }
0x1ee3   :  { %v1723_v7 = vpop.permute.xlu0 %1722 }
0x1ee4   :  { %3886 = vmatmul.mubr.msk.f32.vlgmr.msra.gmra.mrb[20].mxu1 %vm1389_vm10, %v1723_v7 }
0x1ee5   :  { %4223 = vmatpush3.bf16.msk.msra.mxu1 %vm4994_vm9, %v4991_v27  ;;  %3915 = vmatprep.mubr.msk.f32.mxu1 %vm4619_vm1, %v4618_v2 }
0x1ee6   :  { %4224 = vmatprep.subr.bf16.mxu1 %v4622_v25 }
0x1ee7   :  { %v1362_v10 = vpop.permute.xlu0 %1361  ;;  %v1379_v14 = vpop.permute.xlu1 %1378 }
0x1ee8   :  { %v1364_v12 = vadd.f32 %v1362_v10, %v4955_v4  ;;  %3916 = vmatmul.mubr.msk.f32.vlgmr.msra.gmra.mrb[22].mxu1 %vm1389_vm10, %v5057_v16  ;;  %v57_v16 = vld [vmem:[%s5478_s2 + $0x63] sm:$0xff] }
0x1ee9   :  { %4226 = vmatpush3.bf16.msra.mxu1 %v5040_v9  ;;  %3926 = vmatprep.mubr.msk.f32.mxu1 %vm4619_vm1, %v4618_v2  ;;  %v5177_v24 = vpack.c.bf16 %v57_v16, %v56_v15 }
0x1eea   :  { %1382 = vrot.lane.b32.xlu1 %v1364_v12, %s4628_s26  ;;  %4227 = vmatprep.subr.bf16.mxu1 %v4622_v25 }
0x1eeb   :  { %v1375_v13 = vpop.permute.xlu0 %1374 }
0x1eec   :  { %v1390_v17 = vsel %vm1389_vm10, %v1375_v13, %v1379_v14 }
0x1eed   :  { %4230 = vmatpush3.bf16.msk.msra.mxu1 %vm4743_vm5, %v5046_v11 }
0x1eee   :  { %4231 = vmatprep.subr.bf16.mxu1 %v4622_v25 }
0x1eef   :  { %v1370_v4 = vpop.permute.xlu0 %1369 }
0x1ef0   :  { %v1372_v19 = vadd.f32 %v1370_v4, %v5027_v5  ;;  %v58_v5 = vld [vmem:[%s5478_s2 + $0x6b] sm:$0xff]  ;;  %s4629_s2 = smov 10  }
0x1ef1   :  { %v5190_v32 = vpack.c.bf16 %v59_v31, %v58_v5 }
0x1ef3   :  { %v1387_v20 = vpop.permute.xlu0 %1386 }
0x1f5c   :  { %v1383_v18 = vpop.permute.xlu1 %1382 }
0x1f5d   :  { %v1391_v23 = vsel %vm313_vm6, %v1390_v17, %v1383_v18 }
0x1f5e   :  { %v1393_v26 = vsel %vm1392_vm13, %v1391_v23, %v1387_v20 }
0x1f5f   :  { %v1395_v56 = vsel %vm1394_vm14, %v1393_v26, %v1372_v19 }
0x1f60   :  { %3861 = vmatmul.mubr.msk.f32.vlgmr.msra.gmra.mrb[10].mxu0 %vm1415_vm15, %v1395_v56 }
0x1f61   :  { %4206 = vmatpush3.bf16.msra.mxu0 %v5177_v24  ;;  %3908 = vmatprep.mubr.msk.f32.mxu0 %vm4619_vm1, %v4618_v2 }
0x1f62   :  { %4207 = vmatprep.subr.bf16.mxu0 %v4622_v25 }
0x1f65   :  { %4209 = vmatpush3.bf16.msra.mxu0 %v5190_v32 }
0x1f66   :  { %4210 = vmatprep.subr.bf16.mxu0 %v4622_v25 }
0x1f69   :  { %4212 = vmatpush3.bf16.msra.mxu0 %v5200_v37 }
0x1f6a   :  { %4213 = vmatprep.subr.bf16.mxu0 %v4622_v25 }
0x1f6d   :  { %4215 = vmatpush3.bf16.msra.mxu0 %v5210_v42 }
0x1f6e   :  { %4216 = vmatprep.subr.bf16.mxu0 %v4622_v25 }
0x1f71   :  { %4219 = vmatpush3.bf16.msk.msra.mxu0 %vm5142_vm12, %v5221_v51 }
0x1f72   :  { %4251 = vmatprep.subr.bf16.mxu0 %v4622_v25 }
0x1fb7   :  { %v1795_v38 = vpop.f32.mrb[20].mxu1 }
0x1fb8   :  { %v3887_v39 = vpop.f32.mrb[21].mxu1 }
0x1fbb   :  { %v1956_v43 = vpop.f32.mrb[22].mxu1 }
0x1fbc   :  { %v1957_v44 = vadd.f32 %v5012_v36, %v1956_v43  ;;  %v3917_v46 = vpop.f32.mrb[23].mxu1 }
0x1fbe   :  { %4500 = vtanh.f32 %v1957_v44  ;;  %v3443_v54 = vmul.f32 -1.442695, %v1957_v44 }
0x1fc0   :  { %4502 = vpow2.f32 %v3443_v54 }
0x1fc8   :  { %v4501_v53 = vpop.eup %4500 }
0x1fc9   :  { %1969 = vrot.lane.b32.xlu1 %v4501_v53, %s4626_s19 }
0x1fca   :  { %v4503_v55 = vpop.eup %4502 }
0x1fcb   :  { %v1963_v57 = vadd.f32 1.0, %v4503_v55 }
0x1fcd   :  { %4504 = vrcp.f32 %v1963_v57 }
0x1fd7   :  { %v4505_v62 = vpop.eup %4504 }
0x1fd8   :  { %v1967_v3 = vmul.f32 %v4505_v62, %v5022_v0 }
0x2033   :  { %v1489_v58 = vpop.f32.mrb[10].mxu0 }
0x2034   :  { %v5231_v59 = vadd.f32 %v3426_v48, %v1489_v58  ;;  %v3862_v60 = vpop.f32.mrb[11].mxu0 }
0x2036   :  { %v1799_v61 = vadd.f32 %v1795_v38, %v5231_v59 }
0x2038   :  { %4506 = vtanh.f32 %v1799_v61 }
0x203b   :  { %v1970_v63 = vpop.permute.xlu1 %1969 }
0x203c   :  { %v1972_v1 = vmul.f32 %v4505_v62, %v1970_v63 }
0x203e   :  { %1974 = vrot.lane.b32.xlu0 %v1972_v1, %s4627_s27 }
0x2042   :  { %v4507_v8 = vpop.eup %4506 }
0x2043   :  { %3909 = vmatmul.mubr.msk.f32.vlgmr.msra.gmra.mrb[12].mxu0 %vm1415_vm15, %v4507_v8 }
0x2044   :  { %4254 = vmatpush3.bf16.msk.msra.mxu0 %vm4994_vm9, %v4991_v27  ;;  %3963 = vmatprep.mubr.msk.f32.mxu0 %vm4619_vm1, %v4618_v2 }
0x2045   :  { %4255 = vmatprep.subr.bf16.mxu0 %v4622_v25 }
0x20b0   :  { %v1975_v6 = vpop.permute.xlu0 %1974 }
0x20b1   :  { %v1977_v52 = vadd.f32 %v1975_v6, %v1967_v3 }
0x20b3   :  { %4508 = vtanh.f32 %v1977_v52 }
0x20bd   :  { %v4509_v30 = vpop.eup %4508 }
0x20be   :  { %1980 = vrot.lane.b32.xlu1 %v4509_v30, %s4627_s27 }
0x20c2   :  { %1988 = vrot.lane.b32.xlu1 %v5093_v47, %s4625_s12 }
0x2116   :  { %v5246_v7 = vpop.f32.mrb[12].mxu0 }
0x2117   :  { %v3910_v10 = vpop.f32.mrb[13].mxu0 }
0x2130   :  { %v1981_v12 = vpop.permute.xlu1 %1980 }
0x2131   :  { %v1983_v13 = vmul.f32 %v4505_v62, %v1981_v12 }
0x2133   :  { %1985 = vrot.lane.b32.xlu0 %v1983_v13, %s4628_s26 }
0x2134   :  { %v1989_v4 = vpop.permute.xlu1 %1988 }
0x21a5   :  { %v1986_v14 = vpop.permute.xlu0 %1985 }
0x21a6   :  { %v1991_v0 = vsel %vm1389_vm10, %v1986_v14, %v1989_v4  ;;  %3964 = vmatmul.mubr.msk.f32.vlgmr.msra.gmra.mrb[14].mxu0 %vm1389_vm10, %v1986_v14 }
0x21a7   :  { %3927 = vmatmul.mubr.msk.f32.vlgmr.msra.gmra.mrb[24].mxu1 %vm313_vm6, %v1991_v0  ;;  %4257 = vmatpush3.bf16.msra.mxu0 %v5040_v9 }
0x21a8   :  { %4234 = vmatpush3.bf16.msk.msra.mxu1 %vm4994_vm9, %v5085_v45  ;;  %3933 = vmatprep.mubr.msk.f32.mxu1 %vm4619_vm1, %v4618_v2 }
0x21a9   :  { %4258 = vmatprep.subr.bf16.mxu0 %v4622_v25  ;;  %3974 = vmatprep.mubr.msk.f32.mxu0 %vm4619_vm1, %v4618_v2 }
0x21aa   :  { %4235 = vmatprep.subr.bf16.mxu1 %v4622_v25 }
0x21ab   :  { %4261 = vmatpush3.bf16.msk.msra.mxu0 %vm4743_vm5, %v5046_v11 }
0x21ac   :  { %4262 = vmatprep.subr.bf16.mxu0 %v4622_v25 }
0x2279   :  { %v2318_v47 = vpop.f32.mrb[14].mxu0 }
0x227a   :  { %v2319_v15 = vadd.f32 %v5012_v36, %v2318_v47  ;;  %v2061_v16 = vpop.f32.mrb[24].mxu1  ;;  %v3965_v17 = vpop.f32.mrb[15].mxu0 }
0x227b   :  { %v2062_v18 = vadd.f32 %v5068_v22, %v2061_v16  ;;  %v3928_v19 = vpop.f32.mrb[25].mxu1 }
0x227c   :  { %4510 = vtanh.f32 %v2319_v15  ;;  %v3453_v26 = vmul.f32 -1.442695, %v2319_v15 }
0x227d   :  { %4512 = vtanh.f32 %v2062_v18  ;;  %v3446_v56 = vmul.f32 -1.442695, %v2062_v18 }
0x227e   :  { %4514 = vpow2.f32 %v3453_v26 }
0x227f   :  { %4516 = vpow2.f32 %v3446_v56 }
0x2286   :  { %v4511_v20 = vpop.eup %4510 }
0x2287   :  { %v4513_v23 = vpop.eup %4512  ;;  %2331 = vrot.lane.b32.xlu1 %v4511_v20, %s4626_s19 }
0x2288   :  { %2074 = vrot.lane.b32.xlu0 %v4513_v23, %s4626_s19  ;;  %v4515_v5 = vpop.eup %4514 }
0x2289   :  { %v4517_v31 = vpop.eup %4516  ;;  %v2325_v34 = vadd.f32 1.0, %v4515_v5 }
0x228a   :  { %v2068_v35 = vadd.f32 1.0, %v4517_v31 }
0x228b   :  { %4518 = vrcp.f32 %v2325_v34 }
0x228c   :  { %4520 = vrcp.f32 %v2068_v35 }
0x2295   :  { %v4519_v38 = vpop.eup %4518 }
0x2296   :  { %v4521_v40 = vpop.eup %4520  ;;  %v2329_v46 = vmul.f32 %v4519_v38, %v1977_v52 }
0x2297   :  { %v2072_v50 = vmul.f32 %v4521_v40, %v5073_v33 }
0x22f9   :  { %v2332_v39 = vpop.permute.xlu1 %2331 }
0x22fa   :  { %v2334_v41 = vmul.f32 %v4519_v38, %v2332_v39  ;;  %v2075_v43 = vpop.permute.xlu0 %2074 }
0x22fb   :  { %v2077_v44 = vmul.f32 %v4521_v40, %v2075_v43 }
0x22fc   :  { %2336 = vrot.lane.b32.xlu1 %v2334_v41, %s4627_s27 }
0x22fd   :  { %2079 = vrot.lane.b32.xlu0 %v2077_v44, %s4627_s27 }
0x236e   :  { %v2337_v49 = vpop.permute.xlu1 %2336 }
0x236f   :  { %v5273_v53 = vadd.f32 %v2337_v49, %v2329_v46  ;;  %v2080_v54 = vpop.permute.xlu0 %2079 }
0x2370   :  { %v5275_v55 = vadd.f32 %v2080_v54, %v2072_v50 }
0x2371   :  { %4522 = vtanh.f32 %v5273_v53 }
0x2372   :  { %4524 = vtanh.f32 %v5275_v55 }
0x237b   :  { %v4523_v57 = vpop.eup %4522 }
0x237c   :  { %v4525_v48 = vpop.eup %4524  ;;  %2342 = vrot.lane.b32.xlu1 %v4523_v57, %s4627_s27 }
0x237d   :  { %2085 = vrot.lane.b32.xlu0 %v4525_v48, %s4627_s27 }
0x23ee   :  { %v2343_v58 = vpop.permute.xlu1 %2342 }
0x23ef   :  { %v2345_v60 = vmul.f32 %v4519_v38, %v2343_v58  ;;  %v2086_v61 = vpop.permute.xlu0 %2085 }
0x23f0   :  { %v2088_v62 = vmul.f32 %v4521_v40, %v2086_v61 }
0x23f1   :  { %2347 = vrot.lane.b32.xlu1 %v2345_v60, %s4628_s26 }
0x23f2   :  { %2090 = vrot.lane.b32.xlu0 %v2088_v62, %s4628_s26 }
0x23f6   :  { %2350 = vrot.lane.b32.xlu0 %v2088_v62, %s4625_s12 }
0x2463   :  { %v2348_v63 = vpop.permute.xlu1 %2347 }
0x2464   :  { %v2091_v33 = vpop.permute.xlu0 %2090 }
0x2465   :  { %3934 = vmatmul.mubr.msk.f32.vlgmr.msra.gmra.mrb[26].mxu1 %vm1389_vm10, %v2091_v33 }
0x2466   :  { %4237 = vmatpush3.bf16.msra.mxu1 %v5177_v24  ;;  %3956 = vmatprep.mubr.msk.f32.mxu1 %vm4619_vm1, %v4618_v2 }
0x2467   :  { %4238 = vmatprep.subr.bf16.mxu1 %v4622_v25 }
0x2468   :  { %v2351_v1 = vpop.permute.xlu0 %2350 }
0x2469   :  { %v2353_v8 = vsel %vm1389_vm10, %v2348_v63, %v2351_v1 }
0x246a   :  { %3975 = vmatmul.mubr.msk.f32.vlgmr.msra.gmra.mrb[16].mxu0 %vm313_vm6, %v2353_v8  ;;  %4240 = vmatpush3.bf16.msra.mxu1 %v5190_v32 }
0x246b   :  { %4241 = vmatprep.subr.bf16.mxu1 %v4622_v25  ;;  %4265 = vmatpush3.bf16.msk.msra.mxu0 %vm4994_vm9, %v5085_v45 }
0x246c   :  { %3981 = vmatprep.mubr.msk.f32.mxu0 %vm4619_vm1, %v4618_v2  ;;  %4266 = vmatprep.subr.bf16.mxu0 %v4622_v25 }
0x246e   :  { %4243 = vmatpush3.bf16.msra.mxu1 %v5200_v37 }
0x246f   :  { %4244 = vmatprep.subr.bf16.mxu1 %v4622_v25 }
0x2472   :  { %4246 = vmatpush3.bf16.msra.mxu1 %v5210_v42 }
0x2473   :  { %4247 = vmatprep.subr.bf16.mxu1 %v4622_v25 }
0x2476   :  { %4250 = vmatpush3.bf16.msk.msra.mxu1 %vm5142_vm12, %v5221_v51 }
0x2477   :  { %4282 = vmatprep.subr.bf16.mxu1 %v4622_v25 }
0x2538   :  { %v2160_v3 = vpop.f32.mrb[26].mxu1 }
0x2539   :  { %v2164_v6 = vadd.f32 %v2160_v3, %v5231_v59  ;;  %v3935_v52 = vpop.f32.mrb[27].mxu1 }
0x253b   :  { %4526 = vtanh.f32 %v2164_v6 }
0x253d   :  { %v2423_v30 = vpop.f32.mrb[16].mxu0 }
0x253e   :  { %v2424_v10 = vadd.f32 %v5068_v22, %v2423_v30  ;;  %v3976_v12 = vpop.f32.mrb[17].mxu0 }
0x2540   :  { %4528 = vtanh.f32 %v2424_v10  ;;  %v3456_v14 = vmul.f32 -1.442695, %v2424_v10 }
0x2542   :  { %4530 = vpow2.f32 %v3456_v14 }
0x2545   :  { %v4527_v13 = vpop.eup %4526 }
0x2546   :  { %3957 = vmatmul.mubr.msk.f32.vlgmr.msra.gmra.mrb[28].mxu1 %vm1415_vm15, %v4527_v13 }
0x2547   :  { %4285 = vmatpush3.bf16.msk.msra.mxu1 %vm4994_vm9, %v4991_v27  ;;  %4011 = vmatprep.mubr.msk.f32.mxu1 %vm4619_vm1, %v4618_v2 }
0x2548   :  { %4286 = vmatprep.subr.bf16.mxu1 %v4622_v25 }
0x254a   :  { %v4529_v4 = vpop.eup %4528  ;;  %4012 = vmatmul.mubr.msk.f32.vlgmr.msra.gmra.mrb[30].mxu1 %vm1389_vm10, %v2348_v63 }
0x254b   :  { %2436 = vrot.lane.b32.xlu1 %v4529_v4, %s4626_s19  ;;  %4288 = vmatpush3.bf16.msra.mxu1 %v5040_v9 }
0x254c   :  { %4289 = vmatprep.subr.bf16.mxu1 %v4622_v25  ;;  %4022 = vmatprep.mubr.msk.f32.mxu1 %vm4619_vm1, %v4618_v2  ;;  %v4531_v0 = vpop.eup %4530 }
0x254d   :  { %v2430_v47 = vadd.f32 1.0, %v4531_v0 }
0x254f   :  { %4292 = vmatpush3.bf16.msk.msra.mxu1 %vm4743_vm5, %v5046_v11  ;;  %4532 = vrcp.f32 %v2430_v47 }
0x2550   :  { %4293 = vmatprep.subr.bf16.mxu1 %v4622_v25 }
0x2559   :  { %v4533_v15 = vpop.eup %4532 }
0x255a   :  { %v2434_v26 = vmul.f32 %v4533_v15, %v5275_v55 }
0x25bd   :  { %v2437_v16 = vpop.permute.xlu1 %2436 }
0x25be   :  { %v2439_v17 = vmul.f32 %v4533_v15, %v2437_v16 }
0x25c0   :  { %2441 = vrot.lane.b32.xlu0 %v2439_v17, %s4627_s27 }
0x2619   :  { %v5327_v18 = vpop.f32.mrb[28].mxu1 }
0x261a   :  { %v3958_v19 = vpop.f32.mrb[29].mxu1 }
0x261d   :  { %v2680_v20 = vpop.f32.mrb[30].mxu1 }
0x261e   :  { %v4013_v23 = vpop.f32.mrb[31].mxu1  ;;  %v2681_v31 = vadd.f32 %v5012_v36, %v2680_v20 }
0x2620   :  { %v3463_v38 = vmul.f32 -1.442695, %v2681_v31 }
0x2632   :  { %v2442_v56 = vpop.permute.xlu0 %2441 }
0x2633   :  { %v5330_v5 = vadd.f32 %v2442_v56, %v2434_v26 }
0x2635   :  { %4534 = vtanh.f32 %v5330_v5 }
0x2636   :  { %4536 = vtanh.f32 %v2681_v31 }
0x2637   :  { %4538 = vpow2.f32 %v3463_v38 }
0x263f   :  { %v4535_v34 = vpop.eup %4534 }
0x2640   :  { %2447 = vrot.lane.b32.xlu1 %v4535_v34, %s4627_s27  ;;  %v4537_v35 = vpop.eup %4536 }
0x2641   :  { %v4539_v39 = vpop.eup %4538 }
0x2642   :  { %v2687_v40 = vadd.f32 1.0, %v4539_v39 }
0x2644   :  { %2693 = vrot.lane.b32.xlu1 %v4537_v35, %s4626_s19  ;;  %4540 = vrcp.f32 %v2687_v40 }
0x264e   :  { %v4541_v44 = vpop.eup %4540 }
0x264f   :  { %v2691_v54 = vmul.f32 %v4541_v44, %v5273_v53 }
0x26b2   :  { %v2448_v41 = vpop.permute.xlu1 %2447 }
0x26b3   :  { %v2450_v43 = vmul.f32 %v4533_v15, %v2448_v41 }
0x26b5   :  { %2452 = vrot.lane.b32.xlu0 %v2450_v43, %s4628_s26 }
0x26b6   :  { %v2694_v46 = vpop.permute.xlu1 %2693 }
0x26b7   :  { %v2696_v49 = vmul.f32 %v4541_v44, %v2694_v46 }
0x26b9   :  { %2698 = vrot.lane.b32.xlu0 %v2696_v49, %s4627_s27 }
0x2727   :  { %v2453_v50 = vpop.permute.xlu0 %2452 }
0x2728   :  { %3982 = vmatmul.mubr.msk.f32.vlgmr.msra.gmra.mrb[18].mxu0 %vm1389_vm10, %v2453_v50 }
0x2729   :  { %4268 = vmatpush3.bf16.msra.mxu0 %v5177_v24  ;;  %4004 = vmatprep.mubr.msk.f32.mxu0 %vm4619_vm1, %v4618_v2 }
0x272a   :  { %4269 = vmatprep.subr.bf16.mxu0 %v4622_v25 }
0x272b   :  { %v2699_v55 = vpop.permute.xlu0 %2698 }
0x272c   :  { %v5344_v57 = vadd.f32 %v2699_v55, %v2691_v54 }
0x272d   :  { %4271 = vmatpush3.bf16.msra.mxu0 %v5190_v32 }
0x272e   :  { %4542 = vtanh.f32 %v5344_v57  ;;  %4272 = vmatprep.subr.bf16.mxu0 %v4622_v25 }
0x2731   :  { %4274 = vmatpush3.bf16.msra.mxu0 %v5200_v37 }
0x2732   :  { %4275 = vmatprep.subr.bf16.mxu0 %v4622_v25 }
0x2735   :  { %4277 = vmatpush3.bf16.msra.mxu0 %v5210_v42 }
0x2736   :  { %4278 = vmatprep.subr.bf16.mxu0 %v4622_v25 }
0x2738   :  { %v4543_v53 = vpop.eup %4542 }
0x2739   :  { %2704 = vrot.lane.b32.xlu1 %v4543_v53, %s4627_s27  ;;  %4281 = vmatpush3.bf16.msk.msra.mxu0 %vm5142_vm12, %v5221_v51 }
0x273a   :  { %4313 = vmatprep.subr.bf16.mxu0 %v4622_v25 }
0x273d   :  { %2712 = vrot.lane.b32.xlu1 %v2450_v43, %s4625_s12 }
0x27ab   :  { %v2705_v48 = vpop.permute.xlu1 %2704 }
0x27ac   :  { %v2707_v58 = vmul.f32 %v4541_v44, %v2705_v48 }
0x27ae   :  { %2709 = vrot.lane.b32.xlu0 %v2707_v58, %s4628_s26 }
0x27af   :  { %v2713_v63 = vpop.permute.xlu1 %2712 }
0x27fb   :  { %v2522_v60 = vpop.f32.mrb[18].mxu0 }
0x27fc   :  { %v2526_v61 = vadd.f32 %v2522_v60, %v5231_v59  ;;  %v3983_v62 = vpop.f32.mrb[19].mxu0 }
0x27fe   :  { %4544 = vtanh.f32 %v2526_v61 }
0x2808   :  { %v4545_v33 = vpop.eup %4544 }
0x2809   :  { %4005 = vmatmul.mubr.msk.f32.vlgmr.msra.gmra.mrb[20].mxu0 %vm1415_vm15, %v4545_v33 }
0x280a   :  { %4316 = vmatpush3.bf16.msk.msra.mxu0 %vm4994_vm9, %v4991_v27  ;;  %4059 = vmatprep.mubr.msk.f32.mxu0 %vm4619_vm1, %v4618_v2 }
0x280b   :  { %4317 = vmatprep.subr.bf16.mxu0 %v4622_v25 }
0x2820   :  { %v2710_v1 = vpop.permute.xlu0 %2709 }
0x2821   :  { %v2715_v8 = vsel %vm1389_vm10, %v2710_v1, %v2713_v63  ;;  %4060 = vmatmul.mubr.msk.f32.vlgmr.msra.gmra.mrb[22].mxu0 %vm1389_vm10, %v2710_v1 }
0x2822   :  { %4023 = vmatmul.mubr.msk.f32.vlgmr.msra.gmra.mrb[32].mxu1 %vm313_vm6, %v2715_v8  ;;  %4319 = vmatpush3.bf16.msra.mxu0 %v5040_v9 }
0x2823   :  { %4320 = vmatprep.subr.bf16.mxu0 %v4622_v25  ;;  %4070 = vmatprep.mubr.msk.f32.mxu0 %vm4619_vm1, %v4618_v2 }
0x2824   :  { %4296 = vmatpush3.bf16.msk.msra.mxu1 %vm4994_vm9, %v5085_v45  ;;  %4029 = vmatprep.mubr.msk.f32.mxu1 %vm4619_vm1, %v4618_v2 }
0x2825   :  { %4297 = vmatprep.subr.bf16.mxu1 %v4622_v25 }
0x2826   :  { %4323 = vmatpush3.bf16.msk.msra.mxu0 %vm4743_vm5, %v5046_v11 }
0x2827   :  { %4324 = vmatprep.subr.bf16.mxu0 %v4622_v25 }
0x28dc   :  { %v5385_v27 = vpop.f32.mrb[20].mxu0 }
0x28dd   :  { %v4006_v9 = vpop.f32.mrb[21].mxu0 }
0x28f4   :  { %v3042_v3 = vpop.f32.mrb[22].mxu0 }
0x28f5   :  { %v3043_v6 = vadd.f32 %v5012_v36, %v3042_v3  ;;  %v2785_v52 = vpop.f32.mrb[32].mxu1  ;;  %v4061_v30 = vpop.f32.mrb[23].mxu0 }
0x28f6   :  { %v2786_v10 = vadd.f32 %v5068_v22, %v2785_v52  ;;  %v4024_v12 = vpop.f32.mrb[33].mxu1 }
0x28f7   :  { %4546 = vtanh.f32 %v3043_v6  ;;  %v3473_v29 = vmul.f32 -1.442695, %v3043_v6  ;;  %v2601_v6 = vsel %vm78_vm2, %v5385_v27, -inf }
0x28f8   :  { %4548 = vtanh.f32 %v2786_v10  ;;  %v3466_v11 = vmul.f32 -1.442695, %v2786_v10 }
0x28f9   :  { %4550 = vpow2.f32 %v3473_v29 }
0x28fa   :  { %4552 = vpow2.f32 %v3466_v11 }
0x2901   :  { %v4547_v13 = vpop.eup %4546 }
0x2902   :  { %v4549_v4 = vpop.eup %4548  ;;  %3055 = vrot.lane.b32.xlu1 %v4547_v13, %s4626_s19 }
0x2903   :  { %2798 = vrot.lane.b32.xlu0 %v4549_v4, %s4626_s19  ;;  %v4551_v14 = vpop.eup %4550 }
0x2904   :  { %v4553_v0 = vpop.eup %4552  ;;  %v3049_v36 = vadd.f32 1.0, %v4551_v14 }
0x2905   :  { %v2792_v47 = vadd.f32 1.0, %v4553_v0 }
0x2906   :  { %4554 = vrcp.f32 %v3049_v36 }
0x2907   :  { %4556 = vrcp.f32 %v2792_v47 }
0x2910   :  { %v4555_v15 = vpop.eup %4554 }
0x2911   :  { %v4557_v17 = vpop.eup %4556  ;;  %v3053_v26 = vmul.f32 %v4555_v15, %v5344_v57 }
0x2912   :  { %v2796_v31 = vmul.f32 %v4557_v17, %v5330_v5 }
0x2974   :  { %v3056_v16 = vpop.permute.xlu1 %3055 }
0x2975   :  { %v3058_v19 = vmul.f32 %v4555_v15, %v3056_v16  ;;  %v2799_v20 = vpop.permute.xlu0 %2798 }
0x2976   :  { %v2801_v23 = vmul.f32 %v4557_v17, %v2799_v20 }
0x2977   :  { %3060 = vrot.lane.b32.xlu1 %v3058_v19, %s4627_s27 }
0x2978   :  { %2803 = vrot.lane.b32.xlu0 %v2801_v23, %s4627_s27 }
0x29e9   :  { %v3061_v56 = vpop.permute.xlu1 %3060 }
0x29ea   :  { %v3063_v34 = vadd.f32 %v3061_v56, %v3053_v26  ;;  %v2804_v35 = vpop.permute.xlu0 %2803 }
0x29eb   :  { %v2806_v38 = vadd.f32 %v2804_v35, %v2796_v31 }
0x29ec   :  { %4558 = vtanh.f32 %v3063_v34 }
0x29ed   :  { %4560 = vtanh.f32 %v2806_v38 }
0x29f6   :  { %v4559_v39 = vpop.eup %4558 }
0x29f7   :  { %v4561_v40 = vpop.eup %4560  ;;  %3066 = vrot.lane.b32.xlu1 %v4559_v39, %s4627_s27 }
0x29f8   :  { %2809 = vrot.lane.b32.xlu0 %v4561_v40, %s4627_s27 }
0x2a69   :  { %v3067_v41 = vpop.permute.xlu1 %3066 }
0x2a6a   :  { %v3069_v43 = vmul.f32 %v4555_v15, %v3067_v41  ;;  %v2810_v44 = vpop.permute.xlu0 %2809 }
0x2a6b   :  { %v2812_v46 = vmul.f32 %v4557_v17, %v2810_v44 }
0x2a6c   :  { %3071 = vrot.lane.b32.xlu0 %v3069_v43, %s4628_s26 }
0x2a6d   :  { %3074 = vrot.lane.b32.xlu1 %v2812_v46, %s4625_s12  ;;  %s4630_s12 = smov 5  }
0x2ade   :  { %v3072_v5 = vpop.permute.xlu0 %3071 }
0x2adf   :  { %v3075_v49 = vpop.permute.xlu1 %3074 }
0x2ae0   :  { %v3077_v50 = vsel %vm1389_vm10, %v3072_v5, %v3075_v49 }
0x2ae1   :  { %4071 = vmatmul.mubr.msk.f32.vlgmr.msra.gmra.mrb[24].mxu0 %vm313_vm6, %v3077_v50 }
0x2ae2   :  { %4327 = vmatpush3.bf16.msk.msra.mxu0 %vm4994_vm9, %v5085_v45  ;;  %4077 = vmatprep.mubr.msk.f32.mxu0 %vm4619_vm1, %v4618_v2 }
0x2ae3   :  { %4328 = vmatprep.subr.bf16.mxu0 %v4622_v25 }
0x2bb4   :  { %v3147_v54 = vpop.f32.mrb[24].mxu0 }
0x2bb5   :  { %v3148_v55 = vadd.f32 %v5068_v22, %v3147_v54  ;;  %v4072_v57 = vpop.f32.mrb[25].mxu0  ;;  %v2239_v22 = vsel %vm78_vm2, %v5327_v18, -inf }
0x2bb7   :  { %4562 = vtanh.f32 %v3148_v55  ;;  %v3476_v48 = vmul.f32 -1.442695, %v3148_v55 }
0x2bb9   :  { %4564 = vpow2.f32 %v3476_v48 }
0x2bc1   :  { %v4563_v53 = vpop.eup %4562 }
0x2bc2   :  { %3160 = vrot.lane.b32.xlu0 %v4563_v53, %s4626_s19  ;;  %s4631_s19 = smov 20  }
0x2bc3   :  { %v4565_v58 = vpop.eup %4564 }
0x2bc4   :  { %v3154_v60 = vadd.f32 1.0, %v4565_v58 }
0x2bc6   :  { %4566 = vrcp.f32 %v3154_v60 }
0x2bd0   :  { %v4567_v28 = vpop.eup %4566 }
0x2bd1   :  { %v3158_v62 = vmul.f32 %v4567_v28, %v2806_v38 }
0x2c34   :  { %v3161_v45 = vpop.permute.xlu0 %3160 }
0x2c35   :  { %v3163_v61 = vmul.f32 %v4567_v28, %v3161_v45 }
0x2c37   :  { %3165 = vrot.lane.b32.xlu1 %v3163_v61, %s4627_s27 }
0x2c3b   :  { %2814 = vrot.lane.b32.xlu1 %v2812_v46, %s4628_s26 }
0x2c5f   :  { %2240 = vmax.xlane.f32.xlu1 %v2239_v22 }
0x2ca9   :  { %v3166_v33 = vpop.permute.xlu1 %3165 }
0x2caa   :  { %v3168_v63 = vadd.f32 %v3166_v33, %v3158_v62 }
0x2cac   :  { %4568 = vtanh.f32 %v3168_v63 }
0x2cad   :  { %v2815_v1 = vpop.permute.xlu1 %2814 }
0x2cae   :  { %4030 = vmatmul.mubr.msk.f32.vlgmr.msra.gmra.mrb[34].mxu1 %vm1389_vm10, %v2815_v1 }
0x2caf   :  { %4299 = vmatpush3.bf16.msra.mxu1 %v5177_v24  ;;  %4052 = vmatprep.mubr.msk.f32.mxu1 %vm4619_vm1, %v4618_v2 }
0x2cb0   :  { %4300 = vmatprep.subr.bf16.mxu1 %v4622_v25 }
0x2cb3   :  { %4302 = vmatpush3.bf16.msra.mxu1 %v5190_v32 }
0x2cb4   :  { %4303 = vmatprep.subr.bf16.mxu1 %v4622_v25 }
0x2cb6   :  { %v4569_v8 = vpop.eup %4568 }
0x2cb7   :  { %3171 = vrot.lane.b32.xlu0 %v4569_v8, %s4627_s27  ;;  %4305 = vmatpush3.bf16.msra.mxu1 %v5200_v37 }
0x2cb8   :  { %4306 = vmatprep.subr.bf16.mxu1 %v4622_v25 }
0x2cbb   :  { %4308 = vmatpush3.bf16.msra.mxu1 %v5210_v42 }
0x2cbc   :  { %4309 = vmatprep.subr.bf16.mxu1 %v4622_v25 }
0x2cbf   :  { %4312 = vmatpush3.bf16.msk.msra.mxu1 %vm5142_vm12, %v5221_v51 }
0x2cec   :  { %v2241_v0 = vpop.xlane.xlu1 %2240 }
0x2ced   :  { %v2242_v47 = vsub.f32 %v5327_v18, %v2241_v0 }
0x2cef   :  { %v2243_v15 = vmul.f32 1.442695, %v2242_v47 }
0x2d29   :  { %v3172_v9 = vpop.permute.xlu0 %3171 }
0x2d2a   :  { %v3174_v3 = vmul.f32 %v4567_v28, %v3172_v9 }
0x2d2c   :  { %3176 = vrot.lane.b32.xlu0 %v3174_v3, %s4628_s26 }
0x2d4b   :  { %2602 = vmax.xlane.f32.xlu0 %v2601_v6 }
0x2d81   :  { %v2884_v52 = vpop.f32.mrb[34].mxu1 }
0x2d82   :  { %v2888_v30 = vadd.f32 %v2884_v52, %v5231_v59  ;;  %v4031_v10 = vpop.f32.mrb[35].mxu1 }
0x2d84   :  { %4570 = vtanh.f32 %v2888_v30 }
0x2d8e   :  { %v4571_v12 = vpop.eup %4570 }
0x2d8f   :  { %4053 = vmatmul.mubr.msk.f32.vlgmr.msra.gmra.mrb[36].mxu1 %vm1415_vm15, %v4571_v12 }
0x2d9e   :  { %v3177_v13 = vpop.permute.xlu0 %3176 }
0x2d9f   :  { %4078 = vmatmul.mubr.msk.f32.vlgmr.msra.gmra.mrb[26].mxu0 %vm1389_vm10, %v3177_v13 }
0x2da0   :  { %4330 = vmatpush3.bf16.msra.mxu0 %v5177_v24  ;;  %4100 = vmatprep.mubr.msk.f32.mxu0 %vm4619_vm1, %v4618_v2  ;;  %vm3356_vm1 = vcmask 162816  }
0x2da1   :  { %4331 = vmatprep.subr.bf16.mxu0 %v4622_v25 }
0x2da4   :  { %4333 = vmatpush3.bf16.msra.mxu0 %v5190_v32 }
0x2da5   :  { %4334 = vmatprep.subr.bf16.mxu0 %v4622_v25 }
0x2da8   :  { %4336 = vmatpush3.bf16.msra.mxu0 %v5200_v37  ;;  %v1877_v37 = vsel %vm78_vm2, %v5246_v7, -inf }
0x2da9   :  { %4337 = vmatprep.subr.bf16.mxu0 %v4622_v25 }
0x2dac   :  { %4339 = vmatpush3.bf16.msra.mxu0 %v5210_v42 }
0x2dad   :  { %4340 = vmatprep.subr.bf16.mxu0 %v4622_v25 }
0x2db0   :  { %4343 = vmatpush3.bf16.msk.msra.mxu0 %vm5142_vm12, %v5221_v51 }
0x2dd8   :  { %v2603_v24 = vpop.xlane.xlu0 %2602 }
0x2dd9   :  { %v2604_v2 = vsub.f32 %v5385_v27, %v2603_v24 }
0x2ddb   :  { %v2605_v4 = vmul.f32 1.442695, %v2604_v2 }
0x2ddd   :  { %4572 = vpow2.f32 %v2605_v4 }
0x2de7   :  { %v4573_v42 = vpop.eup %4572 }
0x2de8   :  { %v2607_v25 = vsel %vm78_vm2, %v4573_v42, 0.0 }
0x2e62   :  { %v2959_v32 = vpop.f32.mrb[36].mxu1 }
0x2e63   :  { %v4054_v29 = vpop.f32.mrb[37].mxu1  ;;  %v2963_v11 = vsel %vm78_vm2, %v2959_v32, -inf }
0x2e64   :  { %2964 = vmax.xlane.f32.xlu0 %v2963_v11 }
0x2e68   :  { %1878 = vmax.xlane.f32.xlu0 %v1877_v37 }
0x2e6c   :  { %2608 = vadd.xlane.f32.xlu0 %v2607_v25 }
0x2e72   :  { %v3246_v21 = vpop.f32.mrb[26].mxu0 }
0x2e73   :  { %v3250_v51 = vadd.f32 %v3246_v21, %v5231_v59  ;;  %v4079_v14 = vpop.f32.mrb[27].mxu0 }
0x2e75   :  { %4574 = vtanh.f32 %v3250_v51 }
0x2e76   :  { %4576 = vpow2.f32 %v2243_v15 }
0x2e7f   :  { %v4575_v27 = vpop.eup %4574 }
0x2e80   :  { %4101 = vmatmul.mubr.msk.f32.vlgmr.msra.gmra.mrb[28].mxu0 %vm1415_vm15, %v4575_v27  ;;  %v4577_v31 = vpop.eup %4576 }
0x2e81   :  { %v2245_v34 = vsel %vm78_vm2, %v4577_v31, 0.0 }
0x2ef1   :  { %v2965_v36 = vpop.xlane.xlu0 %2964 }
0x2ef2   :  { %v2966_v16 = vsub.f32 %v2959_v32, %v2965_v36 }
0x2ef4   :  { %v2967_v19 = vmul.f32 1.442695, %v2966_v16 }
0x2ef5   :  { %v1879_v17 = vpop.xlane.xlu0 %1878 }
0x2ef6   :  { %v1880_v20 = vsub.f32 %v5246_v7, %v1879_v17  ;;  %4578 = vpow2.f32 %v2967_v19 }
0x2ef8   :  { %v1881_v23 = vmul.f32 1.442695, %v1880_v20 }
0x2ef9   :  { %v2609_v39 = vpop.xlane.xlu0 %2608 }
0x2efa   :  { %4580 = vpow2.f32 %v1881_v23 }
0x2efb   :  { %4582 = vrcp.f32 %v2609_v39 }
0x2f00   :  { %v4579_v35 = vpop.eup %4578 }
0x2f01   :  { %v2969_v18 = vsel %vm78_vm2, %v4579_v35, 0.0 }
0x2f04   :  { %v4581_v38 = vpop.eup %4580 }
0x2f05   :  { %v1883_v7 = vsel %vm78_vm2, %v4581_v38, 0.0  ;;  %v4583_v40 = vpop.eup %4582 }
0x2f06   :  { %v2611_v41 = vmul.f32 %v4583_v40, %v4573_v42 }
0x2f53   :  { %v3321_v59 = vpop.f32.mrb[28].mxu0 }
0x2f54   :  { %v4102_v26 = vpop.f32.mrb[29].mxu0  ;;  %v3325_v56 = vsel %vm78_vm2, %v3321_v59, -inf }
0x2f55   :  { %3326 = vmax.xlane.f32.xlu1 %v3325_v56 }
0x2f59   :  { %2246 = vadd.xlane.f32.xlu1 %v2245_v34 }
0x2f5d   :  { %2970 = vadd.xlane.f32.xlu1 %v2969_v18 }
0x2f61   :  { %1884 = vadd.xlane.f32.xlu1 %v1883_v7 }
0x2f72   :  { %3341 = vrot.lane.b32.xlu1 %v2611_v41, %s4629_s2 }
0x2fe2   :  { %v3327_v43 = vpop.xlane.xlu1 %3326 }
0x2fe3   :  { %v3328_v44 = vsub.f32 %v3321_v59, %v3327_v43 }
0x2fe5   :  { %v3329_v46 = vmul.f32 1.442695, %v3328_v44 }
0x2fe6   :  { %v2247_v5 = vpop.xlane.xlu1 %2246 }
0x2fe7   :  { %4584 = vpow2.f32 %v3329_v46 }
0x2fea   :  { %v2971_v49 = vpop.xlane.xlu1 %2970 }
0x2feb   :  { %4586 = vrcp.f32 %v2971_v49 }
0x2fec   :  { %4588 = vrcp.f32 %v2247_v5 }
0x2fee   :  { %v1885_v45 = vpop.xlane.xlu1 %1884 }
0x2ff1   :  { %v4585_v50 = vpop.eup %4584 }
0x2ff2   :  { %v3331_v54 = vsel %vm78_vm2, %v4585_v50, 0.0  ;;  %v3342_v63 = vpop.permute.xlu1 %3341 }
0x2ff3   :  { %3332 = vadd.xlane.f32.xlu0 %v3331_v54 }
0x2ff5   :  { %v4587_v55 = vpop.eup %4586 }
0x2ff6   :  { %v2973_v57 = vmul.f32 %v4587_v55, %v4579_v35  ;;  %v4589_v53 = vpop.eup %4588 }
0x2ff7   :  { %v2249_v48 = vmul.f32 %v4589_v53, %v4577_v31 }
0x2ff8   :  { %3345 = vrot.lane.b32.xlu1 %v2973_v57, %s4627_s27  ;;  %s4632_s27 = smov [#allocation2]  }
0x2ff9   :  { %s3366_s26 = sshll.u32 %s4632_s27, 4  ;;  %s3367_s26 = int_to_ptr.vmem [resolvable:$true] %s3366_s26 }
0x2ffa   :  { %s4594_s28 = scalar_lea.vmem %s3367_s26, 128  ;;  %p4599_p1 = scmp.lt.s32.totalorder %s3367_s26, %s3367_s26 }
0x2ffb   :  { %p4595_p0 = scmp.ne.s32.totalorder %s3367_s26, %s4594_s28  ;;  %p4600_p2 = scmp.lt.s32.totalorder %s4594_s28, %s4594_s28 }
0x2ffd   :  { %p4601_p3 = por %p4600_p2, %p4599_p1 }
0x2fff   :  { %p4602_p4 = pnand %p4601_p3, %p4595_p0 }
0x3009   :  { %3337 = vrot.lane.b32.xlu0 %v2249_v48, %s4630_s12 }
0x306a   :  { %v3346_v8 = vpop.permute.xlu1 %3345 }
0x3080   :  { %v3333_v58 = vpop.xlane.xlu0 %3332 }
0x3081   :  { %4590 = vrcp.f32 %v3333_v58 }
0x3082   :  { %4592 = vrcp.f32 %v1885_v45 }
0x3084   :  { %v3338_v22 = vpop.permute.xlu0 %3337 }
0x308b   :  { %v4591_v60 = vpop.eup %4590 }
0x308c   :  { %v3335_v28 = vmul.f32 %v4591_v60, %v4585_v50  ;;  %v4593_v61 = vpop.eup %4592 }
0x308d   :  { %v1887_v62 = vmul.f32 %v4593_v61, %v4581_v38 }
0x308e   :  { %3349 = vrot.lane.b32.xlu0 %v3335_v28, %s4631_s19 }
0x308f   :  { %v3352_v33 = vsel %vm78_vm2, %v1887_v62, %v3338_v22 }
0x3090   :  { %v3354_v1 = vsel %vm3353_vm0, %v3352_v33, %v3342_v63 }
0x3091   :  { %v3355_v3 = vsel %vm1389_vm10, %v3354_v1, %v3346_v8 }
0x3100   :  { %v3350_v9 = vpop.permute.xlu0 %3349 }
0x3101   :  { %v3357_v6 = vsel %vm3356_vm1, %v3355_v3, %v3350_v9 }
0x3102   :  { %3359 = vst.msk [vmem:[#allocation2] sm:$0xff] %vm3358_vm3, %v3357_v6 }
0x3103   :  { %4605 = shalt.err (!%p4602_p4)
}
0x3104   :  { %s4606_s30 = scalar_lea.hbm %s5479_s3, 128 }
0x3105   :  { %p4607_p5 = scmp.ne.s32.totalorder %s5479_s3, %s4606_s30  ;;  %p4610_p6 = scmp.lt.u32.totalorder %s4606_s30, %s5479_s3 }
0x3107   :  { %p4612_p7 = pnand %p4610_p6, %p4607_p5 }
0x3109   :  { %4615 = shalt.err (!%p4612_p7)
}
0x310a   :  { %3369 = dma.vmem_to_hbm [thread:$0]  %s3367_s26, 128, %s5479_s3, [#allocation3]  }
0x310b   :  { %4616 = dma.done.wait [#allocation3], 128  }
0x310c   :  { %4617 = vsyncadd [#allocation3], 4294967168 }
0x310d   :  { %3373 = vsyncpa [#allocation3], 1 }

</bundles_post_ra>
